<compile_context>
chip_gen: v7x
topology: tpu7x:2x2x1
jax: 0.10.0
libtpu: 0.0.40
codegen_flags: <defaults>
</compile_context>

<pallas_src>
import jax
import jax.numpy as jnp
from jax.experimental import pallas as pl
from jax.experimental.pallas import tpu as pltpu


def _gated_conv1x1_kernel(w_ref, x_ref, o_ref):
    # w_ref: (Cout, Cin)  -- gate already folded in, resident across the grid
    # x_ref: (Cin, t_hw)  -- streamed activation tile (batch dim squeezed)
    # o_ref: (Cout, t_hw) -- lane-dense output tile
    o_ref[...] = jnp.dot(
        w_ref[...], x_ref[...], preferred_element_type=jnp.float32
    ).astype(o_ref.dtype)


def _select_hw_tile(HW, N, Cin, Cout, itemsize, max_hw_tile, vmem_budget_bytes):
    """Pick the HW (lane) tile width.

    Rules (per perf review):
      - bounded by a VMEM budget (double-buffered in + out tiles), safe on v5e/v6e/v7x
      - multiple of 128 unless it equals the full HW extent
      - tiny problems -> one step (minimize fixed per-step overhead)
      - N == 1 and a large image -> two balanced tiles so both v7x TensorCores work
    """
    per_col_bytes = 2 * (Cin + Cout) * itemsize          # double-buffered in+out per column
    cap = vmem_budget_bytes // per_col_bytes
    cap = min(cap, max_hw_tile)
    cap = max(128, (cap // 128) * 128)

    if HW <= cap:
        # whole image fits in one tile
        traffic_bytes = HW * (Cin + Cout) * itemsize
        if N == 1 and HW >= 256 and traffic_bytes >= (4 << 20):
            # big single image: split into 2 balanced 128-aligned tiles (v7x megacore)
            return ((HW + 255) // 256) * 128
        return HW                                         # single step along HW
    return cap


def se_conv1x1(x_nchw, s_nc11, w_oi11, *,
               max_hw_tile=8192, vmem_budget_bytes=24 << 20):
    """x_nchw: (N, Cin, H, W), s_nc11: (1, Cin, 1, 1), w_oi11: (Cout, Cin, 1, 1).

    If the surrounding model runs bf16, pass x_nchw (and optionally s/w) as bf16:
    the kernel is HBM-bound so halving bytes is a near-2x win; accumulation stays f32.
    """
    N, Cin, H, W = x_nchw.shape
    Cout = w_oi11.shape[0]
    HW = H * W
    dtype = x_nchw.dtype
    itemsize = jnp.dtype(dtype).itemsize

    # Fold the sigmoid gate into the tiny weight:  (x * g) conv W  ==  x conv (W * g)
    # (sigmoid + fold done in f32 on a (Cout, Cin) array: effectively free).
    gate = jax.nn.sigmoid(s_nc11.reshape(1, Cin).astype(jnp.float32))      # (1, Cin)
    w_scaled = (w_oi11.reshape(Cout, Cin).astype(jnp.float32) * gate)      # (Cout, Cin)
    w_scaled = w_scaled.astype(dtype)

    # NCHW -> (N, Cin, HW) is a pure reshape: no HBM transpose pass.
    x_flat = x_nchw.reshape(N, Cin, HW)

    t_hw = _select_hw_tile(HW, N, Cin, Cout, itemsize, max_hw_tile, vmem_budget_bytes)
    num_hw_tiles = pl.cdiv(HW, t_hw)
    grid = (N, num_hw_tiles)   # HW tile innermost: contiguous, sequential HBM streaming

    # Scoped-VMEM limit: double-buffered in+out tiles + weight + slack.
    vmem_need = 2 * (Cin + Cout) * t_hw * itemsize + 2 * Cin * Cout * itemsize
    vmem_limit = max(vmem_need + (2 << 20), 16 << 20)

    cost = pl.CostEstimate(
        flops=2 * N * Cin * Cout * HW,
        transcendentals=0,
        bytes_accessed=itemsize * (N * HW * (Cin + Cout) + Cin * Cout),
    )

    out_flat = pl.pallas_call(
        _gated_conv1x1_kernel,
        out_shape=jax.ShapeDtypeStruct((N, Cout, HW), dtype),
        grid_spec=pltpu.PrefetchScalarGridSpec(
            num_scalar_prefetch=0,
            grid=grid,
            in_specs=[
                # gate-folded weight: resident / reused for every grid step
                pl.BlockSpec((Cout, Cin), lambda n, j: (0, 0)),
                # streamed activation tile; batch dim squeezed out of the kernel ref
                pl.BlockSpec((pl.Squeezed(), Cin, t_hw), lambda n, j: (n, 0, j)),
            ],
            out_specs=pl.BlockSpec((pl.Squeezed(), Cout, t_hw), lambda n, j: (n, 0, j)),
        ),
        compiler_params=pltpu.CompilerParams(
            dimension_semantics=("parallel", "parallel"),
            vmem_limit_bytes=int(vmem_limit),
        ),
        cost_estimate=cost,
    )(w_scaled, x_flat)

    # (N, Cout, HW) -> (N, Cout, H, W): free reshape, already NCHW.
    return out_flat.reshape(N, Cout, H, W)


if __name__ == "__main__":
    # Shapes exactly as in the PyTorch module: x35 (1,144,56,56), x39 (1,144,1,1),
    # Conv2d(144, 24, 1x1, bias=False).  HW = 3136 -> single full-HW grid step here.
    N, Cin, H, W, Cout = 1, 144, 56, 56, 24

    key = jax.random.PRNGKey(0)
    kx, ks, kw = jax.random.split(key, 3)
    x35 = jax.random.normal(kx, (N, Cin, H, W), dtype=jnp.float32)
    x39 = jax.random.normal(ks, (1, Cin, 1, 1), dtype=jnp.float32)
    # deterministic synthetic conv weight (Cout, Cin, 1, 1), no bias
    w = jax.random.normal(kw, (Cout, Cin, 1, 1), dtype=jnp.float32) * 0.05

    out = se_conv1x1(x35, x39, w)
    out = jax.block_until_ready(out)

    # reference check in plain JAX (matches the PyTorch module semantics)
    gated = x35 * jax.nn.sigmoid(x39)
    ref = jax.lax.conv_general_dilated(
        gated, w, window_strides=(1, 1), padding="VALID",
        dimension_numbers=("NCHW", "OIHW", "NCHW"))
    assert out.shape == (N, Cout, H, W)
    assert jnp.allclose(out, ref, atol=1e-4, rtol=1e-4)

    print("KERNEL_OK")
</pallas_src>

<mosaic_0001>
module attributes {stable_mosaic.version = 11 : i64} {
  func.func @_gated_conv1x1_kernel(%arg0: i32, %arg1: i32, %arg2: memref<24x144xf32, #tpu.memory_space<vmem>>, %arg3: memref<1x144x3136xf32, #tpu.memory_space<vmem>>, %arg4: memref<1x24x3136xf32, #tpu.memory_space<vmem>>) attributes {dimension_semantics = [#tpu.dimension_semantics<parallel>, #tpu.dimension_semantics<parallel>], iteration_bounds = array<i64: 1, 1>, scalar_prefetch = 0 : i64, scratch_operands = 0 : i64, tpu.core_type = #tpu.core_type<tc>, window_params = [{pipeline_mode = #tpu.pipeline_mode<synchronous>, transform_indices = @transform_0, window_bounds = array<i64: 24, 144>}, {transform_indices = @transform_1, window_bounds = array<i64: 1, 144, 3136>}, {transform_indices = @transform_2, window_bounds = array<i64: 1, 24, 3136>}]} {
    %c0 = arith.constant 0 : index
    %c0_0 = arith.constant 0 : index
    %0 = vector.load %arg2[%c0, %c0_0] : memref<24x144xf32, #tpu.memory_space<vmem>>, vector<24x144xf32>
    %c0_1 = arith.constant 0 : index
    %c0_2 = arith.constant 0 : index
    %c0_3 = arith.constant 0 : index
    %1 = vector.load %arg3[%c0_1, %c0_2, %c0_3] : memref<1x144x3136xf32, #tpu.memory_space<vmem>>, vector<1x144x3136xf32>
    %2 = vector.shape_cast %1 : vector<1x144x3136xf32> to vector<144x3136xf32>
    %cst = arith.constant dense<0.000000e+00> : vector<24x3136xf32>
    %3 = tpu.matmul %0, %2, %cst {dimension_numbers = #tpu.dot_dimension_numbers<[1], [0], [0], [1], [0, 0, 1, 1], [], []>} : vector<24x144xf32>, vector<144x3136xf32>, vector<24x3136xf32> -> vector<24x3136xf32>
    %c0_4 = arith.constant 0 : index
    %c0_5 = arith.constant 0 : index
    %c0_6 = arith.constant 0 : index
    %4 = vector.load %arg4[%c0_4, %c0_5, %c0_6] : memref<1x24x3136xf32, #tpu.memory_space<vmem>>, vector<1x24x3136xf32>
    %5 = vector.shape_cast %4 : vector<1x24x3136xf32> to vector<24x3136xf32>
    %6 = vector.shape_cast %3 : vector<24x3136xf32> to vector<1x24x3136xf32>
    tpu.vector_store %arg4[%c0_4, %c0_5, %c0_6], %6 {strides = array<i32>} : memref<1x24x3136xf32, #tpu.memory_space<vmem>>, vector<1x24x3136xf32>,
    return
  }
  func.func @transform_0(%arg0: i32, %arg1: i32) -> (i32, i32) {
    %c0_i32 = arith.constant 0 : i32
    %c0_i32_0 = arith.constant 0 : i32
    %c0_i32_1 = arith.constant 0 : i32
    return %c0_i32, %c0_i32_0 : i32, i32
  }
  func.func @transform_1(%arg0: i32, %arg1: i32) -> (i32, i32, i32) {
    %c0_i32 = arith.constant 0 : i32
    %c0_i32_0 = arith.constant 0 : i32
    return %arg0, %c0_i32, %arg1 : i32, i32, i32
  }
  func.func @transform_2(%arg0: i32, %arg1: i32) -> (i32, i32, i32) {
    %c0_i32 = arith.constant 0 : i32
    %c0_i32_0 = arith.constant 0 : i32
    return %arg0, %c0_i32, %arg1 : i32, i32, i32
  }
}

</mosaic_0001>

<bundles_post_ra>
// kernel: tpu_custom_call.1
= control target key start
LH: loop header
LB: loop body
LE: loop exit
PB: predicated region body
PF: predicated region fallthrough
CT: control target
= control target key end

     0   :  { %7 = vsyncpa [#allocation3], 0  ;;  %s2502_s0 = inlined_call_operand.hbm [shape: f32[24,144], index: 0, kind: input, shape index: {}]   ;;  %s2503_s1 = inlined_call_operand.hbm [shape: f32[1,144,3136], index: 1, kind: input, shape index: {}]   ;;  %s2504_s2 = inlined_call_operand.hbm [shape: f32[1,24,3136], index: 2, kind: output, shape index: {}]  }
   0x1   :  { %8 = vsyncpa [#allocation6], 0 }
   0x2   :  { %9 = vsyncpa [#allocation4], 0  ;;  %s2278_s9 = smov [#allocation2]   ;;  %s2206_s13 = scalar_lea.hbm %s2502_s0, 768 }
   0x3   :  { %s15_s10 = sshll.u32 %s2278_s9, 4  ;;  %p2207_p0 = scmp.ne.s32.totalorder %s2502_s0, %s2206_s13  ;;  %s16_s10 = int_to_ptr.vmem [resolvable:$true] %s15_s10 }
   0x4   :  { %p2210_p1 = scmp.lt.u32.totalorder %s2206_s13, %s2502_s0 }
   0x6   :  { %p2212_p2 = pnand %p2210_p1, %p2207_p0 }
   0x8   :  { %2215 = shalt.err (!%p2212_p2)
}
   0x9   :  { %s2216_s18 = scalar_lea.vmem %s16_s10, 768  ;;  %p2221_p4 = scmp.lt.s32.totalorder %s16_s10, %s16_s10 }
   0xa   :  { %p2217_p3 = scmp.ne.s32.totalorder %s16_s10, %s2216_s18  ;;  %p2222_p5 = scmp.lt.s32.totalorder %s2216_s18, %s2216_s18 }
   0xc   :  { %p2223_p6 = por %p2222_p5, %p2221_p4 }
   0xe   :  { %p2224_p7 = pnand %p2223_p6, %p2217_p3 }
  0x10   :  { %2227 = shalt.err (!%p2224_p7)
}
  0x11   :  { %s2279_s19 = smov 256   ;;  %s2280_s20 = smov 16  }
  0x12   :  { %21 = dma.hbm_to_vmem [thread:$0]  %s2502_s0, 768, %s16_s10, [#allocation3], %s2279_s19, %s2279_s19, %s2280_s20  }
  0x13   :  { %s2281_s23 = smov [#allocation5]   ;;  %s2228_s27 = scalar_lea.hbm %s2503_s1, 57600 }
  0x14   :  { %s27_s24 = sshll.u32 %s2281_s23, 4  ;;  %p2229_p8 = scmp.ne.s32.totalorder %s2503_s1, %s2228_s27  ;;  %s28_s24 = int_to_ptr.vmem [resolvable:$true] %s27_s24 }
  0x15   :  { %p2232_p9 = scmp.lt.u32.totalorder %s2228_s27, %s2503_s1 }
  0x17   :  { %p2234_p10 = pnand %p2232_p9, %p2229_p8 }
  0x19   :  { %2237 = shalt.err (!%p2234_p10)
}
  0x1a   :  { %s2238_s4 = scalar_lea.vmem %s28_s24, 57600  ;;  %p2243_p12 = scmp.lt.s32.totalorder %s28_s24, %s28_s24 }
  0x1b   :  { %p2239_p11 = scmp.ne.s32.totalorder %s28_s24, %s2238_s4  ;;  %p2244_p13 = scmp.lt.s32.totalorder %s2238_s4, %s2238_s4 }
  0x1d   :  { %p2245_p0 = por %p2244_p13, %p2243_p12 }
  0x1f   :  { %p2246_p1 = pnand %p2245_p0, %p2239_p11 }
  0x21   :  { %2249 = shalt.err (!%p2246_p1)
}
  0x22   :  { %s2282_s0 = smov 3200   ;;  %s2283_s5 = smov 200  }
  0x23   :  { %33 = dma.hbm_to_vmem [thread:$0]  %s2503_s1, 57600, %s28_s24, [#allocation6], %s2282_s0, %s2282_s0, %s2283_s5  }
  0x24   :  { %2272 = dma.done.wait [#allocation3], 768  }
  0x25   :  { %2273 = vsyncadd [#allocation3], 4294966528 }
  0x26   :  { %2274 = dma.done.wait [#allocation6], 57600  }
  0x27   :  { %2275 = vsyncadd [#allocation6], 4294909696  ;;  %v49_v0 = vld [vmem:[#allocation5 + $0x18] sm:$0xff]  ;;  %v74_v1 = vld [vmem:[#allocation5 + $0xe0] sm:$0xff]  ;;  %vm496_vm0 = vcmask 130048   ;;  %vm1606_vm1 = vcmask 523264  }
  0x28   :  { %v48_v2 = vld [vmem:[#allocation5 + $0x10] sm:$0xff]  ;;  %v1751_v3 = vpack.c.bf16 %v74_v1, %v49_v0  ;;  %v73_v4 = vld [vmem:[#allocation5 + $0xd8] sm:$0xff]  ;;  %v47_v5 = vld [vmem:[#allocation5 + $0x8] sm:$0xff]  ;;  %s2285_s1 = smov [#allocation7]  }
  0x29   :  { %v72_v6 = vld [vmem:[#allocation5 + $0xd0] sm:$0xff]  ;;  %v1753_v7 = vpack.c.bf16 %v73_v4, %v48_v2  ;;  %v46_v9 = vld [vmem:[#allocation5] sm:$0xff]  ;;  %v71_v10 = vld [vmem:[#allocation5 + $0xc8] sm:$0xff]  ;;  %s1663_s8 = sshll.u32 %s2285_s1, 4  ;;  %s1664_s8 = int_to_ptr.vmem [resolvable:$true] %s1663_s8 }
  0x2a   :  { %v1715_v8 = vpack.c.bf16 %v72_v6, %v47_v5  ;;  %v99_v11 = vld [vmem:[#allocation5 + $0x1a8] sm:$0xff]  ;;  %1752 = vmatprep.subr.bf16.mxu1 %v1751_v3  ;;  %v1717_v12 = vpack.c.bf16 %v71_v10, %v46_v9  ;;  %v124_v13 = vld [vmem:[#allocation5 + $0x270] sm:$0xff]  ;;  %v98_v14 = vld [vmem:[#allocation5 + $0x1a0] sm:$0xff]  ;;  %s2250_s9 = scalar_lea.vmem %s1664_s8, 9600  ;;  %p2255_p3 = scmp.lt.s32.totalorder %s1664_s8, %s1664_s8 }
  0x2b   :  { %v123_v15 = vld [vmem:[#allocation5 + $0x268] sm:$0xff]  ;;  %1754 = vmatpush1.bf16.msra.mxu1 %v1753_v7  ;;  %v1755_v16 = vpack.c.bf16 %v124_v13, %v99_v11  ;;  %v97_v18 = vld [vmem:[#allocation5 + $0x198] sm:$0xff]  ;;  %v122_v19 = vld [vmem:[#allocation5 + $0x260] sm:$0xff]  ;;  %p2251_p2 = scmp.ne.s32.totalorder %s1664_s8, %s2250_s9  ;;  %p2256_p4 = scmp.lt.s32.totalorder %s2250_s9, %s2250_s9 }
  0x2c   :  { %1716 = vmatprep.subr.bf16.mxu0 %v1715_v8  ;;  %v1757_v17 = vpack.c.bf16 %v123_v15, %v98_v14  ;;  %v96_v20 = vld [vmem:[#allocation5 + $0x190] sm:$0xff]  ;;  %v1719_v21 = vpack.c.bf16 %v122_v19, %v97_v18  ;;  %v121_v22 = vld [vmem:[#allocation5 + $0x258] sm:$0xff]  ;;  %v174_v24 = vld [vmem:[#allocation5 + $0x400] sm:$0xff] }
  0x2d   :  { %1718 = vmatpush1.bf16.msra.mxu0 %v1717_v12  ;;  %v149_v23 = vld [vmem:[#allocation5 + $0x338] sm:$0xff]  ;;  %1756 = vmatprep.subr.bf16.mxu1 %v1755_v16  ;;  %v1721_v25 = vpack.c.bf16 %v121_v22, %v96_v20  ;;  %v148_v27 = vld [vmem:[#allocation5 + $0x330] sm:$0xff]  ;;  %v147_v29 = vld [vmem:[#allocation5 + $0x328] sm:$0xff]  ;;  %p2257_p5 = por %p2256_p4, %p2255_p3 }
  0x2e   :  { %v1759_v26 = vpack.c.bf16 %v174_v24, %v149_v23  ;;  %v173_v28 = vld [vmem:[#allocation5 + $0x3f8] sm:$0xff]  ;;  %1720 = vmatprep.subr.bf16.mxu0 %v1719_v21  ;;  %v172_v30 = vld [vmem:[#allocation5 + $0x3f0] sm:$0xff]  ;;  %v146_v31 = vld [vmem:[#allocation5 + $0x320] sm:$0xff] }
  0x2f   :  { %v171_v32 = vld [vmem:[#allocation5 + $0x3e8] sm:$0xff]  ;;  %1758 = vmatpush1.bf16.msra.mxu1 %v1757_v17  ;;  %v1761_v33 = vpack.c.bf16 %v173_v28, %v148_v27  ;;  %v1723_v34 = vpack.c.bf16 %v172_v30, %v147_v29  ;;  %v224_v36 = vld [vmem:[#allocation5 + $0x590] sm:$0xff]  ;;  %v198_v37 = vld [vmem:[#allocation5 + $0x4c0] sm:$0xff]  ;;  %p2258_p6 = pnand %p2257_p5, %p2251_p2 }
  0x30   :  { %v199_v35 = vld [vmem:[#allocation5 + $0x4c8] sm:$0xff]  ;;  %1760 = vmatprep.subr.bf16.mxu1 %v1759_v26  ;;  %v1725_v38 = vpack.c.bf16 %v171_v32, %v146_v31  ;;  %v197_v41 = vld [vmem:[#allocation5 + $0x4b8] sm:$0xff]  ;;  %v222_v42 = vld [vmem:[#allocation5 + $0x580] sm:$0xff] }
  0x31   :  { %1722 = vmatpush1.bf16.msra.mxu0 %v1721_v25  ;;  %v1763_v39 = vpack.c.bf16 %v224_v36, %v199_v35  ;;  %v223_v40 = vld [vmem:[#allocation5 + $0x588] sm:$0xff]  ;;  %v1727_v43 = vpack.c.bf16 %v222_v42, %v197_v41  ;;  %v196_v44 = vld [vmem:[#allocation5 + $0x4b0] sm:$0xff]  ;;  %v221_v45 = vld [vmem:[#allocation5 + $0x578] sm:$0xff] }
  0x32   :  { %1724 = vmatprep.subr.bf16.mxu0 %v1723_v34  ;;  %v249_v46 = vld [vmem:[#allocation5 + $0x658] sm:$0xff]  ;;  %v274_v47 = vld [vmem:[#allocation5 + $0x720] sm:$0xff]  ;;  %v1765_v48 = vpack.c.bf16 %v223_v40, %v198_v37  ;;  %v247_v49 = vld [vmem:[#allocation5 + $0x648] sm:$0xff]  ;;  %v1729_v51 = vpack.c.bf16 %v221_v45, %v196_v44 }
  0x33   :  { %1762 = vmatpush1.bf16.msra.mxu1 %v1761_v33  ;;  %v272_v50 = vld [vmem:[#allocation5 + $0x710] sm:$0xff]  ;;  %v1767_v52 = vpack.c.bf16 %v274_v47, %v249_v46  ;;  %v273_v54 = vld [vmem:[#allocation5 + $0x718] sm:$0xff]  ;;  %v246_v55 = vld [vmem:[#allocation5 + $0x640] sm:$0xff] }
  0x34   :  { %1764 = vmatprep.subr.bf16.mxu1 %v1763_v39  ;;  %v248_v53 = vld [vmem:[#allocation5 + $0x650] sm:$0xff]  ;;  %v1731_v56 = vpack.c.bf16 %v272_v50, %v247_v49  ;;  %v271_v57 = vld [vmem:[#allocation5 + $0x708] sm:$0xff]  ;;  %v297_v60 = vld [vmem:[#allocation5 + $0x7d8] sm:$0xff] }
  0x35   :  { %1726 = vmatpush1.bf16.msra.mxu0 %v1725_v38  ;;  %v299_v58 = vld [vmem:[#allocation5 + $0x7e8] sm:$0xff]  ;;  %v324_v59 = vld [vmem:[#allocation5 + $0x8b0] sm:$0xff]  ;;  %v322_v61 = vld [vmem:[#allocation5 + $0x8a0] sm:$0xff]  ;;  %v1769_v62 = vpack.c.bf16 %v273_v54, %v248_v53  ;;  %v1733_v63 = vpack.c.bf16 %v271_v57, %v246_v55 }
  0x36   :  { %1728 = vmatprep.subr.bf16.mxu0 %v1727_v43  ;;  %v1771_v0 = vpack.c.bf16 %v324_v59, %v299_v58  ;;  %v298_v1 = vld [vmem:[#allocation5 + $0x7e0] sm:$0xff]  ;;  %v323_v2 = vld [vmem:[#allocation5 + $0x8a8] sm:$0xff]  ;;  %v296_v3 = vld [vmem:[#allocation5 + $0x7d0] sm:$0xff]  ;;  %v1735_v4 = vpack.c.bf16 %v322_v61, %v297_v60 }
  0x37   :  { %1766 = vmatpush1.bf16.msra.mxu1 %v1765_v48  ;;  %v321_v5 = vld [vmem:[#allocation5 + $0x898] sm:$0xff]  ;;  %v374_v7 = vld [vmem:[#allocation5 + $0xa40] sm:$0xff]  ;;  %v347_v8 = vld [vmem:[#allocation5 + $0x968] sm:$0xff]  ;;  %v1773_v10 = vpack.c.bf16 %v323_v2, %v298_v1 }
  0x38   :  { %1768 = vmatprep.subr.bf16.mxu1 %v1767_v52  ;;  %v349_v6 = vld [vmem:[#allocation5 + $0x978] sm:$0xff]  ;;  %v372_v9 = vld [vmem:[#allocation5 + $0xa30] sm:$0xff]  ;;  %v1737_v11 = vpack.c.bf16 %v321_v5, %v296_v3  ;;  %v346_v15 = vld [vmem:[#allocation5 + $0x960] sm:$0xff] }
  0x39   :  { %1730 = vmatpush1.bf16.msra.mxu0 %v1729_v51  ;;  %v1775_v12 = vpack.c.bf16 %v374_v7, %v349_v6  ;;  %v348_v13 = vld [vmem:[#allocation5 + $0x970] sm:$0xff]  ;;  %v373_v14 = vld [vmem:[#allocation5 + $0xa38] sm:$0xff]  ;;  %v1739_v16 = vpack.c.bf16 %v372_v9, %v347_v8  ;;  %v371_v17 = vld [vmem:[#allocation5 + $0xa28] sm:$0xff] }
  0x3a   :  { %1732 = vmatprep.subr.bf16.mxu0 %v1731_v56  ;;  %v399_v18 = vld [vmem:[#allocation5 + $0xb08] sm:$0xff]  ;;  %v424_v19 = vld [vmem:[#allocation5 + $0xbd0] sm:$0xff]  ;;  %v397_v20 = vld [vmem:[#allocation5 + $0xaf8] sm:$0xff]  ;;  %v1777_v23 = vpack.c.bf16 %v373_v14, %v348_v13  ;;  %v1741_v24 = vpack.c.bf16 %v371_v17, %v346_v15 }
  0x3b   :  { %1770 = vmatpush1.bf16.msra.mxu1 %v1769_v62  ;;  %v422_v21 = vld [vmem:[#allocation5 + $0xbc0] sm:$0xff]  ;;  %v2328_v22 = vld [vmem:[#allocation2 + $0x8] sm:$0xff]  ;;  %v1779_v25 = vpack.c.bf16 %v424_v19, %v399_v18  ;;  %v423_v27 = vld [vmem:[#allocation5 + $0xbc8] sm:$0xff] }
  0x3c   :  { %1772 = vmatprep.subr.bf16.mxu1 %v1771_v0  ;;  %1679 = vmatprep.mubr.msk.f32.mxu1 %vm496_vm0, %v2328_v22  ;;  %v398_v26 = vld [vmem:[#allocation5 + $0xb00] sm:$0xff]  ;;  %v396_v28 = vld [vmem:[#allocation5 + $0xaf0] sm:$0xff]  ;;  %v1743_v29 = vpack.c.bf16 %v422_v21, %v397_v20  ;;  %v421_v30 = vld [vmem:[#allocation5 + $0xbb8] sm:$0xff] }
  0x3d   :  { %1734 = vmatpush1.bf16.msra.mxu0 %v1733_v63  ;;  %v449_v31 = vld [vmem:[#allocation5 + $0xc98] sm:$0xff]  ;;  %v474_v32 = vld [vmem:[#allocation5 + $0xd60] sm:$0xff]  ;;  %1676 = vmatprep.mubr.msk.f32.mxu0 %vm496_vm0, %v2328_v22  ;;  %v447_v33 = vld [vmem:[#allocation5 + $0xc88] sm:$0xff]  ;;  %v1781_v35 = vpack.c.bf16 %v423_v27, %v398_v26  ;;  %v1745_v36 = vpack.c.bf16 %v421_v30, %v396_v28 }
  0x3e   :  { %1736 = vmatprep.subr.bf16.mxu0 %v1735_v4  ;;  %v472_v34 = vld [vmem:[#allocation5 + $0xd50] sm:$0xff]  ;;  %v1783_v37 = vpack.c.bf16 %v474_v32, %v449_v31  ;;  %v473_v39 = vld [vmem:[#allocation5 + $0xd58] sm:$0xff]  ;;  %v446_v40 = vld [vmem:[#allocation5 + $0xc80] sm:$0xff] }
  0x3f   :  { %1774 = vmatpush1.bf16.msra.mxu1 %v1773_v10  ;;  %v448_v38 = vld [vmem:[#allocation5 + $0xc90] sm:$0xff]  ;;  %v1747_v41 = vpack.c.bf16 %v472_v34, %v447_v33  ;;  %v471_v42 = vld [vmem:[#allocation5 + $0xd48] sm:$0xff]  ;;  %v53_v43 = vld [vmem:[#allocation5 + $0x38] sm:$0xff] }
  0x40   :  { %1776 = vmatprep.subr.bf16.mxu1 %v1775_v12  ;;  %v78_v44 = vld [vmem:[#allocation5 + $0x100] sm:$0xff]  ;;  %v51_v45 = vld [vmem:[#allocation5 + $0x28] sm:$0xff]  ;;  %v76_v46 = vld [vmem:[#allocation5 + $0xf0] sm:$0xff]  ;;  %v1785_v47 = vpack.c.bf16 %v473_v39, %v448_v38  ;;  %v1749_v48 = vpack.c.bf16 %v471_v42, %v446_v40 }
  0x41   :  { %1738 = vmatpush1.bf16.msra.mxu0 %v1737_v11  ;;  %v1823_v49 = vpack.c.bf16 %v78_v44, %v53_v43  ;;  %v52_v50 = vld [vmem:[#allocation5 + $0x30] sm:$0xff]  ;;  %v77_v51 = vld [vmem:[#allocation5 + $0xf8] sm:$0xff]  ;;  %v50_v52 = vld [vmem:[#allocation5 + $0x20] sm:$0xff]  ;;  %v1787_v53 = vpack.c.bf16 %v76_v46, %v51_v45 }
  0x42   :  { %1740 = vmatprep.subr.bf16.mxu0 %v1739_v16  ;;  %v75_v54 = vld [vmem:[#allocation5 + $0xe8] sm:$0xff]  ;;  %v128_v56 = vld [vmem:[#allocation5 + $0x290] sm:$0xff]  ;;  %v101_v57 = vld [vmem:[#allocation5 + $0x1b8] sm:$0xff]  ;;  %v1825_v60 = vpack.c.bf16 %v77_v51, %v52_v50 }
  0x43   :  { %1778 = vmatpush1.bf16.msra.mxu1 %v1777_v23  ;;  %v103_v55 = vld [vmem:[#allocation5 + $0x1c8] sm:$0xff]  ;;  %v126_v58 = vld [vmem:[#allocation5 + $0x280] sm:$0xff]  ;;  %v2334_v59 = vld [vmem:[#allocation2] sm:$0xff]  ;;  %v1789_v61 = vpack.c.bf16 %v75_v54, %v50_v52 }
  0x44   :  { %1780 = vmatprep.subr.bf16.mxu1 %v1779_v25  ;;  %v1827_v62 = vpack.c.bf16 %v128_v56, %v103_v55  ;;  %v102_v63 = vld [vmem:[#allocation5 + $0x1c0] sm:$0xff]  ;;  %v127_v0 = vld [vmem:[#allocation5 + $0x288] sm:$0xff]  ;;  %v100_v1 = vld [vmem:[#allocation5 + $0x1b0] sm:$0xff]  ;;  %v1791_v2 = vpack.c.bf16 %v126_v58, %v101_v57 }
  0x45   :  { %1742 = vmatpush1.bf16.msra.mxu0 %v1741_v24  ;;  %v125_v3 = vld [vmem:[#allocation5 + $0x278] sm:$0xff]  ;;  %v178_v5 = vld [vmem:[#allocation5 + $0x420] sm:$0xff]  ;;  %v151_v6 = vld [vmem:[#allocation5 + $0x348] sm:$0xff]  ;;  %v1829_v8 = vpack.c.bf16 %v127_v0, %v102_v63 }
  0x46   :  { %1744 = vmatprep.subr.bf16.mxu0 %v1743_v29  ;;  %v153_v4 = vld [vmem:[#allocation5 + $0x358] sm:$0xff]  ;;  %v176_v7 = vld [vmem:[#allocation5 + $0x410] sm:$0xff]  ;;  %v1793_v10 = vpack.c.bf16 %v125_v3, %v100_v1  ;;  %v150_v13 = vld [vmem:[#allocation5 + $0x340] sm:$0xff] }
  0x47   :  { %1782 = vmatpush1.bf16.msra.mxu1 %v1781_v35  ;;  %v152_v9 = vld [vmem:[#allocation5 + $0x350] sm:$0xff]  ;;  %v1831_v11 = vpack.c.bf16 %v178_v5, %v153_v4  ;;  %v177_v12 = vld [vmem:[#allocation5 + $0x418] sm:$0xff]  ;;  %v175_v14 = vld [vmem:[#allocation5 + $0x408] sm:$0xff]  ;;  %v1795_v15 = vpack.c.bf16 %v176_v7, %v151_v6 }
  0x48   :  { %1784 = vmatprep.subr.bf16.mxu1 %v1783_v37  ;;  %v203_v16 = vld [vmem:[#allocation5 + $0x4e8] sm:$0xff]  ;;  %v228_v17 = vld [vmem:[#allocation5 + $0x5b0] sm:$0xff]  ;;  %v201_v19 = vld [vmem:[#allocation5 + $0x4d8] sm:$0xff]  ;;  %v1833_v23 = vpack.c.bf16 %v177_v12, %v152_v9  ;;  %v1797_v25 = vpack.c.bf16 %v175_v14, %v150_v13 }
  0x49   :  { %1746 = vmatpush1.bf16.msra.mxu0 %v1745_v36  ;;  %v2338_v18 = vld [vmem:[#allocation2 + $0x18] sm:$0xff]  ;;  %v226_v20 = vld [vmem:[#allocation5 + $0x5a0] sm:$0xff]  ;;  %v1835_v26 = vpack.c.bf16 %v228_v17, %v203_v16  ;;  %v200_v28 = vld [vmem:[#allocation5 + $0x4d0] sm:$0xff] }
  0x4a   :  { %1748 = vmatprep.subr.bf16.mxu0 %v1747_v41  ;;  %v2342_v21 = vld [vmem:[#allocation2 + $0x10] sm:$0xff]  ;;  %v227_v27 = vld [vmem:[#allocation5 + $0x5a8] sm:$0xff]  ;;  %v2347_v29 = vld [vmem:[#allocation2 + $0x28] sm:$0xff]  ;;  %v1799_v30 = vpack.c.bf16 %v226_v20, %v201_v19 }
  0x4b   :  { %1786 = vmatpush1.bf16.msra.mxu1 %v1785_v47  ;;  %v202_v24 = vld [vmem:[#allocation5 + $0x4e0] sm:$0xff]  ;;  %v225_v31 = vld [vmem:[#allocation5 + $0x598] sm:$0xff]  ;;  %v251_v34 = vld [vmem:[#allocation5 + $0x668] sm:$0xff] }
  0x4c   :  { %1824 = vmatprep.subr.bf16.mxu1 %v1823_v49  ;;  %v253_v32 = vld [vmem:[#allocation5 + $0x678] sm:$0xff]  ;;  %v278_v33 = vld [vmem:[#allocation5 + $0x740] sm:$0xff]  ;;  %v276_v35 = vld [vmem:[#allocation5 + $0x730] sm:$0xff]  ;;  %v1837_v37 = vpack.c.bf16 %v227_v27, %v202_v24  ;;  %v1801_v38 = vpack.c.bf16 %v225_v31, %v200_v28 }
  0x4d   :  { %1750 = vmatpush1.bf16.msra.mxu0 %v1749_v48  ;;  %v2352_v36 = vld [vmem:[#allocation2 + $0x20] sm:$0xff]  ;;  %v1839_v39 = vpack.c.bf16 %v278_v33, %v253_v32  ;;  %v277_v41 = vld [vmem:[#allocation5 + $0x738] sm:$0xff]  ;;  %v250_v42 = vld [vmem:[#allocation5 + $0x660] sm:$0xff]  ;;  %v1803_v43 = vpack.c.bf16 %v276_v35, %v251_v34 }
  0x4e   :  { %1788 = vmatprep.subr.bf16.mxu0 %v1787_v53  ;;  %654 = vmatmul.mubr.f32.vlgmr.msra.gmra.mrb[0].mxu1 %v2334_v59  ;;  %v252_v40 = vld [vmem:[#allocation5 + $0x670] sm:$0xff]  ;;  %v275_v44 = vld [vmem:[#allocation5 + $0x728] sm:$0xff]  ;;  %v301_v47 = vld [vmem:[#allocation5 + $0x7f8] sm:$0xff] }
  0x4f   :  { %1826 = vmatpush1.bf16.msra.mxu1 %v1825_v60  ;;  %1680 = vmatprep.mubr.msk.f32.mxu1 %vm496_vm0, %v2338_v18  ;;  %v303_v45 = vld [vmem:[#allocation5 + $0x808] sm:$0xff]  ;;  %v328_v46 = vld [vmem:[#allocation5 + $0x8d0] sm:$0xff]  ;;  %v326_v48 = vld [vmem:[#allocation5 + $0x8c0] sm:$0xff]  ;;  %v1841_v49 = vpack.c.bf16 %v277_v41, %v252_v40  ;;  %v1805_v50 = vpack.c.bf16 %v275_v44, %v250_v42 }
  0x50   :  { %571 = vmatmul.mubr.f32.vlgmr.msra.gmra.mrb[0].mxu0 %v2334_v59  ;;  %1828 = vmatprep.subr.bf16.mxu1 %v1827_v62  ;;  %v1843_v51 = vpack.c.bf16 %v328_v46, %v303_v45  ;;  %v302_v52 = vld [vmem:[#allocation5 + $0x800] sm:$0xff]  ;;  %v327_v53 = vld [vmem:[#allocation5 + $0x8c8] sm:$0xff]  ;;  %v300_v54 = vld [vmem:[#allocation5 + $0x7f0] sm:$0xff]  ;;  %v1807_v55 = vpack.c.bf16 %v326_v48, %v301_v47 }
  0x51   :  { %1790 = vmatpush1.bf16.msra.mxu0 %v1789_v61  ;;  %1677 = vmatprep.mubr.msk.f32.mxu0 %vm496_vm0, %v2338_v18  ;;  %v325_v56 = vld [vmem:[#allocation5 + $0x8b8] sm:$0xff]  ;;  %v378_v58 = vld [vmem:[#allocation5 + $0xa60] sm:$0xff]  ;;  %v351_v60 = vld [vmem:[#allocation5 + $0x988] sm:$0xff]  ;;  %v1845_v62 = vpack.c.bf16 %v327_v53, %v302_v52 }
  0x52   :  { %1792 = vmatprep.subr.bf16.mxu0 %v1791_v2  ;;  %660 = vmatmul.mubr.f32.gmra.mrb[2].mxu1 %v2342_v21  ;;  %v353_v57 = vld [vmem:[#allocation5 + $0x998] sm:$0xff]  ;;  %v376_v61 = vld [vmem:[#allocation5 + $0xa50] sm:$0xff]  ;;  %v1809_v63 = vpack.c.bf16 %v325_v56, %v300_v54  ;;  %v350_v3 = vld [vmem:[#allocation5 + $0x980] sm:$0xff] }
  0x53   :  { %1830 = vmatpush1.bf16.msra.mxu1 %v1829_v8  ;;  %1681 = vmatprep.mubr.msk.f32.mxu1 %vm496_vm0, %v2347_v29  ;;  %v1847_v0 = vpack.c.bf16 %v378_v58, %v353_v57  ;;  %v352_v1 = vld [vmem:[#allocation5 + $0x990] sm:$0xff]  ;;  %v377_v2 = vld [vmem:[#allocation5 + $0xa58] sm:$0xff]  ;;  %v1811_v4 = vpack.c.bf16 %v376_v61, %v351_v60  ;;  %v375_v5 = vld [vmem:[#allocation5 + $0xa48] sm:$0xff] }
  0x54   :  { %577 = vmatmul.mubr.f32.gmra.mrb[2].mxu0 %v2342_v21  ;;  %1832 = vmatprep.subr.bf16.mxu1 %v1831_v11  ;;  %v403_v6 = vld [vmem:[#allocation5 + $0xb28] sm:$0xff]  ;;  %v428_v7 = vld [vmem:[#allocation5 + $0xbf0] sm:$0xff]  ;;  %v401_v8 = vld [vmem:[#allocation5 + $0xb18] sm:$0xff]  ;;  %v1813_v11 = vpack.c.bf16 %v375_v5, %v350_v3 }
  0x55   :  { %1794 = vmatpush1.bf16.msra.mxu0 %v1793_v10  ;;  %1678 = vmatprep.mubr.msk.f32.mxu0 %vm496_vm0, %v2347_v29  ;;  %v426_v9 = vld [vmem:[#allocation5 + $0xbe0] sm:$0xff]  ;;  %v1849_v10 = vpack.c.bf16 %v377_v2, %v352_v1  ;;  %v1851_v12 = vpack.c.bf16 %v428_v7, %v403_v6  ;;  %v427_v14 = vld [vmem:[#allocation5 + $0xbe8] sm:$0xff]  ;;  %v425_v17 = vld [vmem:[#allocation5 + $0xbd8] sm:$0xff] }
  0x56   :  { %1796 = vmatprep.subr.bf16.mxu0 %v1795_v15  ;;  %666 = vmatmul.mubr.f32.gmra.mrb[4].mxu1 %v2352_v36  ;;  %v402_v13 = vld [vmem:[#allocation5 + $0xb20] sm:$0xff]  ;;  %v400_v15 = vld [vmem:[#allocation5 + $0xb10] sm:$0xff]  ;;  %v1815_v16 = vpack.c.bf16 %v426_v9, %v401_v8  ;;  %v453_v19 = vld [vmem:[#allocation5 + $0xcb8] sm:$0xff] }
  0x57   :  { %1834 = vmatpush1.bf16.msra.mxu1 %v1833_v23  ;;  %1685 = vmatprep.mubr.msk.f32.mxu1 %vm496_vm0, %v2328_v22  ;;  %v478_v20 = vld [vmem:[#allocation5 + $0xd80] sm:$0xff]  ;;  %v451_v23 = vld [vmem:[#allocation5 + $0xca8] sm:$0xff]  ;;  %v476_v24 = vld [vmem:[#allocation5 + $0xd70] sm:$0xff] }
  0x58   :  { %583 = vmatmul.mubr.f32.gmra.mrb[4].mxu0 %v2352_v36  ;;  %1836 = vmatprep.subr.bf16.mxu1 %v1835_v26  ;;  %v1817_v26 = vpack.c.bf16 %v425_v17, %v400_v15  ;;  %v1855_v27 = vpack.c.bf16 %v478_v20, %v453_v19  ;;  %v452_v28 = vld [vmem:[#allocation5 + $0xcb0] sm:$0xff]  ;;  %v450_v31 = vld [vmem:[#allocation5 + $0xca0] sm:$0xff]  ;;  %v1819_v32 = vpack.c.bf16 %v476_v24, %v451_v23  ;;  %v475_v33 = vld [vmem:[#allocation5 + $0xd68] sm:$0xff] }
  0x59   :  { %1798 = vmatpush1.bf16.msra.mxu0 %v1797_v25  ;;  %1682 = vmatprep.mubr.msk.f32.mxu0 %vm496_vm0, %v2328_v22  ;;  %v1853_v25 = vpack.c.bf16 %v427_v14, %v402_v13  ;;  %v57_v34 = vld [vmem:[#allocation5 + $0x58] sm:$0xff]  ;;  %v82_v35 = vld [vmem:[#allocation5 + $0x120] sm:$0xff]  ;;  %v1821_v40 = vpack.c.bf16 %v475_v33, %v450_v31  ;;  %v56_v42 = vld [vmem:[#allocation5 + $0x50] sm:$0xff] }
  0x5a   :  { %1800 = vmatprep.subr.bf16.mxu0 %v1799_v30  ;;  %v477_v30 = vld [vmem:[#allocation5 + $0xd78] sm:$0xff]  ;;  %v1895_v41 = vpack.c.bf16 %v82_v35, %v57_v34  ;;  %v54_v44 = vld [vmem:[#allocation5 + $0x40] sm:$0xff]  ;;  %v79_v46 = vld [vmem:[#allocation5 + $0x108] sm:$0xff] }
  0x5b   :  { %1838 = vmatpush1.bf16.msra.mxu1 %v1837_v37  ;;  %v55_v37 = vld [vmem:[#allocation5 + $0x48] sm:$0xff]  ;;  %v132_v48 = vld [vmem:[#allocation5 + $0x2b0] sm:$0xff]  ;;  %v1861_v52 = vpack.c.bf16 %v79_v46, %v54_v44  ;;  %v106_v54 = vld [vmem:[#allocation5 + $0x1e0] sm:$0xff] }
  0x5c   :  { %1840 = vmatprep.subr.bf16.mxu1 %v1839_v39  ;;  %v1857_v39 = vpack.c.bf16 %v477_v30, %v452_v28  ;;  %v107_v47 = vld [vmem:[#allocation5 + $0x1e8] sm:$0xff]  ;;  %v104_v56 = vld [vmem:[#allocation5 + $0x1d0] sm:$0xff]  ;;  %v129_v58 = vld [vmem:[#allocation5 + $0x298] sm:$0xff] }
  0x5d   :  { %1802 = vmatpush1.bf16.msra.mxu0 %v1801_v38  ;;  %v80_v38 = vld [vmem:[#allocation5 + $0x110] sm:$0xff]  ;;  %v1899_v53 = vpack.c.bf16 %v132_v48, %v107_v47  ;;  %v157_v60 = vld [vmem:[#allocation5 + $0x378] sm:$0xff]  ;;  %v182_v61 = vld [vmem:[#allocation5 + $0x440] sm:$0xff]  ;;  %v1865_v1 = vpack.c.bf16 %v129_v58, %v104_v56 }
  0x5e   :  { %1804 = vmatprep.subr.bf16.mxu0 %v1803_v43  ;;  %v81_v43 = vld [vmem:[#allocation5 + $0x118] sm:$0xff]  ;;  %v1859_v45 = vpack.c.bf16 %v80_v38, %v55_v37  ;;  %v1903_v2 = vpack.c.bf16 %v182_v61, %v157_v60  ;;  %v156_v3 = vld [vmem:[#allocation5 + $0x370] sm:$0xff]  ;;  %v154_v5 = vld [vmem:[#allocation5 + $0x360] sm:$0xff] }
  0x5f   :  { %1842 = vmatpush1.bf16.msra.mxu1 %v1841_v49  ;;  %v105_v49 = vld [vmem:[#allocation5 + $0x1d8] sm:$0xff]  ;;  %v179_v7 = vld [vmem:[#allocation5 + $0x428] sm:$0xff]  ;;  %v232_v9 = vld [vmem:[#allocation5 + $0x5d0] sm:$0xff] }
  0x60   :  { %1844 = vmatprep.subr.bf16.mxu1 %v1843_v51  ;;  %v1897_v51 = vpack.c.bf16 %v81_v43, %v56_v42  ;;  %v207_v8 = vld [vmem:[#allocation5 + $0x508] sm:$0xff]  ;;  %v1869_v13 = vpack.c.bf16 %v179_v7, %v154_v5  ;;  %v206_v15 = vld [vmem:[#allocation5 + $0x500] sm:$0xff]  ;;  %v204_v17 = vld [vmem:[#allocation5 + $0x4f0] sm:$0xff] }
  0x61   :  { %1806 = vmatpush1.bf16.msra.mxu0 %v1805_v50  ;;  %v130_v50 = vld [vmem:[#allocation5 + $0x2a0] sm:$0xff]  ;;  %v1907_v14 = vpack.c.bf16 %v232_v9, %v207_v8  ;;  %v229_v20 = vld [vmem:[#allocation5 + $0x5b8] sm:$0xff]  ;;  %v256_v31 = vld [vmem:[#allocation5 + $0x690] sm:$0xff] }
  0x62   :  { %1808 = vmatprep.subr.bf16.mxu0 %v1807_v55  ;;  %v131_v55 = vld [vmem:[#allocation5 + $0x2a8] sm:$0xff]  ;;  %v1863_v57 = vpack.c.bf16 %v130_v50, %v105_v49  ;;  %v257_v23 = vld [vmem:[#allocation5 + $0x698] sm:$0xff]  ;;  %v282_v24 = vld [vmem:[#allocation5 + $0x760] sm:$0xff]  ;;  %v1873_v28 = vpack.c.bf16 %v229_v20, %v204_v17 }
  0x63   :  { %1846 = vmatpush1.bf16.msra.mxu1 %v1845_v62  ;;  %v155_v62 = vld [vmem:[#allocation5 + $0x368] sm:$0xff]  ;;  %v1911_v30 = vpack.c.bf16 %v282_v24, %v257_v23  ;;  %v254_v33 = vld [vmem:[#allocation5 + $0x680] sm:$0xff]  ;;  %v332_v38 = vld [vmem:[#allocation5 + $0x8f0] sm:$0xff] }
  0x64   :  { %1848 = vmatprep.subr.bf16.mxu1 %v1847_v0  ;;  %v1901_v0 = vpack.c.bf16 %v131_v55, %v106_v54  ;;  %v279_v35 = vld [vmem:[#allocation5 + $0x748] sm:$0xff]  ;;  %v306_v44 = vld [vmem:[#allocation5 + $0x820] sm:$0xff]  ;;  %v304_v46 = vld [vmem:[#allocation5 + $0x810] sm:$0xff] }
  0x65   :  { %1810 = vmatpush1.bf16.msra.mxu0 %v1809_v63  ;;  %v180_v63 = vld [vmem:[#allocation5 + $0x430] sm:$0xff]  ;;  %v307_v37 = vld [vmem:[#allocation5 + $0x828] sm:$0xff]  ;;  %v1877_v42 = vpack.c.bf16 %v279_v35, %v254_v33  ;;  %v329_v48 = vld [vmem:[#allocation5 + $0x8d8] sm:$0xff] }
  0x66   :  { %1812 = vmatprep.subr.bf16.mxu0 %v1811_v4  ;;  %v181_v4 = vld [vmem:[#allocation5 + $0x438] sm:$0xff]  ;;  %v1867_v6 = vpack.c.bf16 %v180_v63, %v155_v62  ;;  %v1915_v43 = vpack.c.bf16 %v332_v38, %v307_v37  ;;  %v382_v50 = vld [vmem:[#allocation5 + $0xa80] sm:$0xff]  ;;  %v1881_v54 = vpack.c.bf16 %v329_v48, %v304_v46  ;;  %v356_v56 = vld [vmem:[#allocation5 + $0x9b0] sm:$0xff] }
  0x67   :  { %1850 = vmatpush1.bf16.msra.mxu1 %v1849_v10  ;;  %v205_v10 = vld [vmem:[#allocation5 + $0x4f8] sm:$0xff]  ;;  %v354_v58 = vld [vmem:[#allocation5 + $0x9a0] sm:$0xff]  ;;  %v379_v61 = vld [vmem:[#allocation5 + $0xa68] sm:$0xff] }
  0x68   :  { %1852 = vmatprep.subr.bf16.mxu1 %v1851_v12  ;;  %v1905_v12 = vpack.c.bf16 %v181_v4, %v156_v3  ;;  %v357_v49 = vld [vmem:[#allocation5 + $0x9b8] sm:$0xff]  ;;  %v407_v62 = vld [vmem:[#allocation5 + $0xb48] sm:$0xff]  ;;  %v432_v63 = vld [vmem:[#allocation5 + $0xc10] sm:$0xff]  ;;  %v1885_v3 = vpack.c.bf16 %v379_v61, %v354_v58 }
  0x69   :  { %1814 = vmatpush1.bf16.msra.mxu0 %v1813_v11  ;;  %v230_v11 = vld [vmem:[#allocation5 + $0x5c0] sm:$0xff]  ;;  %v1919_v55 = vpack.c.bf16 %v382_v50, %v357_v49  ;;  %v1923_v4 = vpack.c.bf16 %v432_v63, %v407_v62  ;;  %v404_v7 = vld [vmem:[#allocation5 + $0xb30] sm:$0xff]  ;;  %v429_v9 = vld [vmem:[#allocation5 + $0xbf8] sm:$0xff] }
  0x6a   :  { %1816 = vmatprep.subr.bf16.mxu0 %v1815_v16  ;;  %v231_v16 = vld [vmem:[#allocation5 + $0x5c8] sm:$0xff]  ;;  %v1871_v19 = vpack.c.bf16 %v230_v11, %v205_v10  ;;  %v406_v5 = vld [vmem:[#allocation5 + $0xb40] sm:$0xff]  ;;  %v457_v10 = vld [vmem:[#allocation5 + $0xcd8] sm:$0xff] }
  0x6b   :  { %1854 = vmatpush1.bf16.msra.mxu1 %v1853_v25  ;;  %v255_v25 = vld [vmem:[#allocation5 + $0x688] sm:$0xff]  ;;  %v482_v11 = vld [vmem:[#allocation5 + $0xda0] sm:$0xff]  ;;  %v456_v17 = vld [vmem:[#allocation5 + $0xcd0] sm:$0xff] }
  0x6c   :  { %1856 = vmatprep.subr.bf16.mxu1 %v1855_v27  ;;  %v1909_v27 = vpack.c.bf16 %v231_v16, %v206_v15  ;;  %v1889_v15 = vpack.c.bf16 %v429_v9, %v404_v7  ;;  %v1927_v16 = vpack.c.bf16 %v482_v11, %v457_v10  ;;  %v454_v20 = vld [vmem:[#allocation5 + $0xcc0] sm:$0xff]  ;;  %v479_v24 = vld [vmem:[#allocation5 + $0xd88] sm:$0xff]  ;;  %v60_v33 = vld [vmem:[#allocation5 + $0x70] sm:$0xff] }
  0x6d   :  { %1818 = vmatpush1.bf16.msra.mxu0 %v1817_v26  ;;  %v280_v26 = vld [vmem:[#allocation5 + $0x750] sm:$0xff]  ;;  %v58_v35 = vld [vmem:[#allocation5 + $0x60] sm:$0xff]  ;;  %v83_v38 = vld [vmem:[#allocation5 + $0x128] sm:$0xff] }
  0x6e   :  { %1820 = vmatprep.subr.bf16.mxu0 %v1819_v32  ;;  %v281_v32 = vld [vmem:[#allocation5 + $0x758] sm:$0xff]  ;;  %v1875_v34 = vpack.c.bf16 %v280_v26, %v255_v25  ;;  %v86_v26 = vld [vmem:[#allocation5 + $0x140] sm:$0xff]  ;;  %v108_v48 = vld [vmem:[#allocation5 + $0x1f0] sm:$0xff] }
  0x6f   :  { %1858 = vmatpush1.bf16.msra.mxu1 %v1857_v39  ;;  %v305_v39 = vld [vmem:[#allocation5 + $0x818] sm:$0xff]  ;;  %v110_v46 = vld [vmem:[#allocation5 + $0x200] sm:$0xff]  ;;  %v160_v58 = vld [vmem:[#allocation5 + $0x390] sm:$0xff] }
  0x70   :  { %1896 = vmatprep.subr.bf16.mxu1 %v1895_v41  ;;  %v1913_v41 = vpack.c.bf16 %v281_v32, %v256_v31  ;;  %v61_v25 = vld [vmem:[#allocation5 + $0x78] sm:$0xff]  ;;  %v1893_v31 = vpack.c.bf16 %v479_v24, %v454_v20  ;;  %v158_v61 = vld [vmem:[#allocation5 + $0x380] sm:$0xff]  ;;  %v183_v63 = vld [vmem:[#allocation5 + $0x448] sm:$0xff] }
  0x71   :  { %1822 = vmatpush1.bf16.msra.mxu0 %v1821_v40  ;;  %v330_v40 = vld [vmem:[#allocation5 + $0x8e0] sm:$0xff]  ;;  %v1967_v32 = vpack.c.bf16 %v86_v26, %v61_v25  ;;  %v133_v50 = vld [vmem:[#allocation5 + $0x2b8] sm:$0xff]  ;;  %v208_v9 = vld [vmem:[#allocation5 + $0x510] sm:$0xff] }
  0x72   :  { %1860 = vmatprep.subr.bf16.mxu0 %v1859_v45  ;;  %820 = vmatmul.mubr.f32.vlgmr.msra.gmra.mrb[6].mxu1 %v2334_v59  ;;  %v331_v45 = vld [vmem:[#allocation5 + $0x8e8] sm:$0xff]  ;;  %v1879_v47 = vpack.c.bf16 %v330_v40, %v305_v39  ;;  %v136_v40 = vld [vmem:[#allocation5 + $0x2d0] sm:$0xff]  ;;  %v210_v7 = vld [vmem:[#allocation5 + $0x520] sm:$0xff] }
  0x73   :  { %1898 = vmatpush1.bf16.msra.mxu1 %v1897_v51  ;;  %1686 = vmatprep.mubr.msk.f32.mxu1 %vm496_vm0, %v2338_v18  ;;  %v355_v51 = vld [vmem:[#allocation5 + $0x9a8] sm:$0xff]  ;;  %v233_v11 = vld [vmem:[#allocation5 + $0x5d8] sm:$0xff]  ;;  %v260_v20 = vld [vmem:[#allocation5 + $0x6b0] sm:$0xff] }
  0x74   :  { %737 = vmatmul.mubr.f32.vlgmr.msra.gmra.mrb[6].mxu0 %v2334_v59  ;;  %1900 = vmatprep.subr.bf16.mxu1 %v1899_v53  ;;  %v1917_v53 = vpack.c.bf16 %v331_v45, %v306_v44  ;;  %v111_v39 = vld [vmem:[#allocation5 + $0x208] sm:$0xff]  ;;  %v1933_v44 = vpack.c.bf16 %v83_v38, %v58_v35  ;;  %v258_v24 = vld [vmem:[#allocation5 + $0x6a0] sm:$0xff]  ;;  %v308_v38 = vld [vmem:[#allocation5 + $0x830] sm:$0xff] }
  0x75   :  { %1862 = vmatpush1.bf16.msra.mxu0 %v1861_v52  ;;  %1683 = vmatprep.mubr.msk.f32.mxu0 %vm496_vm0, %v2338_v18  ;;  %v380_v52 = vld [vmem:[#allocation5 + $0xa70] sm:$0xff]  ;;  %v1971_v45 = vpack.c.bf16 %v136_v40, %v111_v39  ;;  %v283_v26 = vld [vmem:[#allocation5 + $0x768] sm:$0xff]  ;;  %v310_v35 = vld [vmem:[#allocation5 + $0x840] sm:$0xff] }
  0x76   :  { %1864 = vmatprep.subr.bf16.mxu0 %v1863_v57  ;;  %826 = vmatmul.mubr.f32.gmra.mrb[8].mxu1 %v2342_v21  ;;  %v381_v57 = vld [vmem:[#allocation5 + $0xa78] sm:$0xff]  ;;  %v1883_v60 = vpack.c.bf16 %v380_v52, %v355_v51  ;;  %v186_v52 = vld [vmem:[#allocation5 + $0x460] sm:$0xff] }
  0x77   :  { %1902 = vmatpush1.bf16.msra.mxu1 %v1901_v0  ;;  %1687 = vmatprep.mubr.msk.f32.mxu1 %vm496_vm0, %v2347_v29  ;;  %v405_v0 = vld [vmem:[#allocation5 + $0xb38] sm:$0xff] }
  0x78   :  { %1904 = vmatprep.subr.bf16.mxu1 %v1903_v2  ;;  %743 = vmatmul.mubr.f32.gmra.mrb[8].mxu0 %v2342_v21  ;;  %v1921_v2 = vpack.c.bf16 %v381_v57, %v356_v56  ;;  %v161_v51 = vld [vmem:[#allocation5 + $0x398] sm:$0xff]  ;;  %v1937_v56 = vpack.c.bf16 %v133_v50, %v108_v48 }
  0x79   :  { %1866 = vmatpush1.bf16.msra.mxu0 %v1865_v1  ;;  %1684 = vmatprep.mubr.msk.f32.mxu0 %vm496_vm0, %v2347_v29  ;;  %v430_v1 = vld [vmem:[#allocation5 + $0xc00] sm:$0xff]  ;;  %v1975_v57 = vpack.c.bf16 %v186_v52, %v161_v51  ;;  %v333_v40 = vld [vmem:[#allocation5 + $0x8f8] sm:$0xff]  ;;  %v383_v51 = vld [vmem:[#allocation5 + $0xa88] sm:$0xff] }
  0x7a   :  { %1868 = vmatprep.subr.bf16.mxu0 %v1867_v6  ;;  %832 = vmatmul.mubr.f32.gmra.mrb[10].mxu1 %v2352_v36  ;;  %v431_v6 = vld [vmem:[#allocation5 + $0xc08] sm:$0xff]  ;;  %v1887_v8 = vpack.c.bf16 %v430_v1, %v405_v0  ;;  %v236_v1 = vld [vmem:[#allocation5 + $0x5f0] sm:$0xff]  ;;  %v385_v48 = vld [vmem:[#allocation5 + $0xa98] sm:$0xff] }
  0x7b   :  { %1906 = vmatpush1.bf16.msra.mxu1 %v1905_v12  ;;  %1691 = vmatprep.mubr.msk.f32.mxu1 %vm496_vm0, %v2328_v22  ;;  %v455_v12 = vld [vmem:[#allocation5 + $0xcc8] sm:$0xff] }
  0x7c   :  { %1908 = vmatprep.subr.bf16.mxu1 %v1907_v14  ;;  %749 = vmatmul.mubr.f32.gmra.mrb[10].mxu0 %v2352_v36  ;;  %v1925_v14 = vpack.c.bf16 %v431_v6, %v406_v5  ;;  %v211_v0 = vld [vmem:[#allocation5 + $0x528] sm:$0xff]  ;;  %v1941_v5 = vpack.c.bf16 %v183_v63, %v158_v61 }
  0x7d   :  { %1870 = vmatpush1.bf16.msra.mxu0 %v1869_v13  ;;  %1688 = vmatprep.mubr.msk.f32.mxu0 %vm496_vm0, %v2328_v22  ;;  %v480_v13 = vld [vmem:[#allocation5 + $0xd90] sm:$0xff]  ;;  %v1979_v6 = vpack.c.bf16 %v236_v1, %v211_v0  ;;  %v411_v52 = vld [vmem:[#allocation5 + $0xb68] sm:$0xff]  ;;  %v433_v0 = vld [vmem:[#allocation5 + $0xc18] sm:$0xff] }
  0x7e   :  { %1872 = vmatprep.subr.bf16.mxu0 %v1871_v19  ;;  %v481_v19 = vld [vmem:[#allocation5 + $0xd98] sm:$0xff]  ;;  %v1891_v23 = vpack.c.bf16 %v480_v13, %v455_v12  ;;  %v286_v13 = vld [vmem:[#allocation5 + $0x780] sm:$0xff]  ;;  %v435_v61 = vld [vmem:[#allocation5 + $0xc28] sm:$0xff] }
  0x7f   :  { %1910 = vmatpush1.bf16.msra.mxu1 %v1909_v27  ;;  %v59_v27 = vld [vmem:[#allocation5 + $0x68] sm:$0xff]  ;;  %v261_v12 = vld [vmem:[#allocation5 + $0x6b8] sm:$0xff] }
  0x80   :  { %1912 = vmatprep.subr.bf16.mxu1 %v1911_v30  ;;  %v1929_v30 = vpack.c.bf16 %v481_v19, %v456_v17  ;;  %v1945_v17 = vpack.c.bf16 %v233_v11, %v208_v9  ;;  %v1983_v19 = vpack.c.bf16 %v286_v13, %v261_v12  ;;  %v461_v1 = vld [vmem:[#allocation5 + $0xcf8] sm:$0xff]  ;;  %v483_v12 = vld [vmem:[#allocation5 + $0xda8] sm:$0xff] }
  0x81   :  { %1874 = vmatpush1.bf16.msra.mxu0 %v1873_v28  ;;  %v84_v28 = vld [vmem:[#allocation5 + $0x130] sm:$0xff]  ;;  %v485_v9 = vld [vmem:[#allocation5 + $0xdb8] sm:$0xff] }
  0x82   :  { %1876 = vmatprep.subr.bf16.mxu0 %v1875_v34  ;;  %v85_v34 = vld [vmem:[#allocation5 + $0x138] sm:$0xff]  ;;  %v1931_v37 = vpack.c.bf16 %v84_v28, %v59_v27  ;;  %v311_v27 = vld [vmem:[#allocation5 + $0x848] sm:$0xff]  ;;  %v336_v28 = vld [vmem:[#allocation5 + $0x910] sm:$0xff] }
  0x83   :  { %1914 = vmatpush1.bf16.msra.mxu1 %v1913_v41  ;;  %v109_v41 = vld [vmem:[#allocation5 + $0x1f8] sm:$0xff] }
  0x84   :  { %1916 = vmatprep.subr.bf16.mxu1 %v1915_v43  ;;  %v1969_v43 = vpack.c.bf16 %v85_v34, %v60_v33  ;;  %v1949_v33 = vpack.c.bf16 %v283_v26, %v258_v24  ;;  %v1987_v34 = vpack.c.bf16 %v336_v28, %v311_v27  ;;  %v65_v13 = vld [vmem:[#allocation5 + $0x98] sm:$0xff]  ;;  %v87_v27 = vld [vmem:[#allocation5 + $0x148] sm:$0xff] }
  0x85   :  { %1878 = vmatpush1.bf16.msra.mxu0 %v1877_v42  ;;  %v134_v42 = vld [vmem:[#allocation5 + $0x2c0] sm:$0xff]  ;;  %v89_v24 = vld [vmem:[#allocation5 + $0x158] sm:$0xff]  ;;  %v115_v28 = vld [vmem:[#allocation5 + $0x228] sm:$0xff] }
  0x86   :  { %1880 = vmatprep.subr.bf16.mxu0 %v1879_v47  ;;  %v135_v47 = vld [vmem:[#allocation5 + $0x2c8] sm:$0xff]  ;;  %v1935_v49 = vpack.c.bf16 %v134_v42, %v109_v41  ;;  %v361_v41 = vld [vmem:[#allocation5 + $0x9d8] sm:$0xff]  ;;  %v386_v42 = vld [vmem:[#allocation5 + $0xaa0] sm:$0xff] }
  0x87   :  { %1918 = vmatpush1.bf16.msra.mxu1 %v1917_v53  ;;  %v159_v53 = vld [vmem:[#allocation5 + $0x388] sm:$0xff] }
  0x88   :  { %1920 = vmatprep.subr.bf16.mxu1 %v1919_v55  ;;  %v1973_v55 = vpack.c.bf16 %v135_v47, %v110_v46  ;;  %v1991_v46 = vpack.c.bf16 %v386_v42, %v361_v41  ;;  %v360_v47 = vld [vmem:[#allocation5 + $0x9d0] sm:$0xff]  ;;  %v137_v41 = vld [vmem:[#allocation5 + $0x2d8] sm:$0xff] }
  0x89   :  { %1882 = vmatpush1.bf16.msra.mxu0 %v1881_v54  ;;  %v184_v54 = vld [vmem:[#allocation5 + $0x450] sm:$0xff]  ;;  %v165_v42 = vld [vmem:[#allocation5 + $0x3b8] sm:$0xff] }
  0x8a   :  { %1884 = vmatprep.subr.bf16.mxu0 %v1883_v60  ;;  %v185_v60 = vld [vmem:[#allocation5 + $0x458] sm:$0xff]  ;;  %v1939_v62 = vpack.c.bf16 %v184_v54, %v159_v53  ;;  %v436_v53 = vld [vmem:[#allocation5 + $0xc30] sm:$0xff] }
  0x8b   :  { %1922 = vmatpush1.bf16.msra.mxu1 %v1921_v2  ;;  %v209_v2 = vld [vmem:[#allocation5 + $0x518] sm:$0xff] }
  0x8c   :  { %1924 = vmatprep.subr.bf16.mxu1 %v1923_v4  ;;  %v1977_v4 = vpack.c.bf16 %v185_v60, %v160_v58  ;;  %v409_v54 = vld [vmem:[#allocation5 + $0xb58] sm:$0xff]  ;;  %v1995_v58 = vpack.c.bf16 %v436_v53, %v411_v52  ;;  %v410_v60 = vld [vmem:[#allocation5 + $0xb60] sm:$0xff]  ;;  %v187_v52 = vld [vmem:[#allocation5 + $0x468] sm:$0xff] }
  0x8d   :  { %1886 = vmatpush1.bf16.msra.mxu0 %v1885_v3  ;;  %v234_v3 = vld [vmem:[#allocation5 + $0x5e0] sm:$0xff]  ;;  %v215_v53 = vld [vmem:[#allocation5 + $0x548] sm:$0xff] }
  0x8e   :  { %1888 = vmatprep.subr.bf16.mxu0 %v1887_v8  ;;  %v235_v8 = vld [vmem:[#allocation5 + $0x5e8] sm:$0xff]  ;;  %v1943_v10 = vpack.c.bf16 %v234_v3, %v209_v2  ;;  %v486_v2 = vld [vmem:[#allocation5 + $0xdc0] sm:$0xff] }
  0x8f   :  { %1926 = vmatpush1.bf16.msra.mxu1 %v1925_v14  ;;  %v259_v14 = vld [vmem:[#allocation5 + $0x6a8] sm:$0xff] }
  0x90   :  { %1928 = vmatprep.subr.bf16.mxu1 %v1927_v16  ;;  %v1981_v16 = vpack.c.bf16 %v235_v8, %v210_v7  ;;  %v459_v3 = vld [vmem:[#allocation5 + $0xce8] sm:$0xff]  ;;  %v1999_v7 = vpack.c.bf16 %v486_v2, %v461_v1  ;;  %v460_v8 = vld [vmem:[#allocation5 + $0xcf0] sm:$0xff]  ;;  %v265_v1 = vld [vmem:[#allocation5 + $0x6d8] sm:$0xff] }
  0x91   :  { %1890 = vmatpush1.bf16.msra.mxu0 %v1889_v15  ;;  %v284_v15 = vld [vmem:[#allocation5 + $0x770] sm:$0xff]  ;;  %v290_v2 = vld [vmem:[#allocation5 + $0x7a0] sm:$0xff] }
  0x92   :  { %1892 = vmatprep.subr.bf16.mxu0 %v1891_v23  ;;  %v285_v23 = vld [vmem:[#allocation5 + $0x778] sm:$0xff]  ;;  %v1947_v25 = vpack.c.bf16 %v284_v15, %v259_v14  ;;  %v90_v14 = vld [vmem:[#allocation5 + $0x160] sm:$0xff]  ;;  %v63_v15 = vld [vmem:[#allocation5 + $0x88] sm:$0xff] }
  0x93   :  { %1930 = vmatpush1.bf16.msra.mxu1 %v1929_v30  ;;  %v309_v30 = vld [vmem:[#allocation5 + $0x838] sm:$0xff] }
  0x94   :  { %1968 = vmatprep.subr.bf16.mxu1 %v1967_v32  ;;  %v1985_v32 = vpack.c.bf16 %v285_v23, %v260_v20  ;;  %v2039_v20 = vpack.c.bf16 %v90_v14, %v65_v13  ;;  %v64_v23 = vld [vmem:[#allocation5 + $0x90] sm:$0xff]  ;;  %v338_v14 = vld [vmem:[#allocation5 + $0x920] sm:$0xff] }
  0x95   :  { %1894 = vmatpush1.bf16.msra.mxu0 %v1893_v31  ;;  %v334_v31 = vld [vmem:[#allocation5 + $0x900] sm:$0xff]  ;;  %v340_v13 = vld [vmem:[#allocation5 + $0x930] sm:$0xff] }
  0x96   :  { %1932 = vmatprep.subr.bf16.mxu0 %v1931_v37  ;;  %986 = vmatmul.mubr.f32.vlgmr.msra.gmra.mrb[12].mxu1 %v2334_v59  ;;  %v335_v37 = vld [vmem:[#allocation5 + $0x908] sm:$0xff]  ;;  %v1951_v39 = vpack.c.bf16 %v334_v31, %v309_v30  ;;  %v140_v30 = vld [vmem:[#allocation5 + $0x2f0] sm:$0xff]  ;;  %v113_v31 = vld [vmem:[#allocation5 + $0x218] sm:$0xff] }
  0x97   :  { %1970 = vmatpush1.bf16.msra.mxu1 %v1969_v43  ;;  %1692 = vmatprep.mubr.msk.f32.mxu1 %vm496_vm0, %v2338_v18  ;;  %v359_v43 = vld [vmem:[#allocation5 + $0x9c8] sm:$0xff] }
  0x98   :  { %903 = vmatmul.mubr.f32.vlgmr.msra.gmra.mrb[12].mxu0 %v2334_v59  ;;  %1972 = vmatprep.subr.bf16.mxu1 %v1971_v45  ;;  %v1989_v45 = vpack.c.bf16 %v335_v37, %v310_v35  ;;  %v2043_v35 = vpack.c.bf16 %v140_v30, %v115_v28  ;;  %v114_v37 = vld [vmem:[#allocation5 + $0x220] sm:$0xff]  ;;  %v388_v28 = vld [vmem:[#allocation5 + $0xab0] sm:$0xff] }
  0x99   :  { %1934 = vmatpush1.bf16.msra.mxu0 %v1933_v44  ;;  %1689 = vmatprep.mubr.msk.f32.mxu0 %vm496_vm0, %v2338_v18  ;;  %v384_v44 = vld [vmem:[#allocation5 + $0xa90] sm:$0xff] }
  0x9a   :  { %1936 = vmatprep.subr.bf16.mxu0 %v1935_v49  ;;  %992 = vmatmul.mubr.f32.gmra.mrb[14].mxu1 %v2342_v21  ;;  %v358_v49 = vld [vmem:[#allocation5 + $0x9c0] sm:$0xff]  ;;  %v1955_v50 = vpack.c.bf16 %v384_v44, %v359_v43  ;;  %v163_v44 = vld [vmem:[#allocation5 + $0x3a8] sm:$0xff] }
  0x9b   :  { %1974 = vmatpush1.bf16.msra.mxu1 %v1973_v55  ;;  %1693 = vmatprep.mubr.msk.f32.mxu1 %vm496_vm0, %v2347_v29  ;;  %v434_v55 = vld [vmem:[#allocation5 + $0xc20] sm:$0xff] }
  0x9c   :  { %1976 = vmatprep.subr.bf16.mxu1 %v1975_v57  ;;  %909 = vmatmul.mubr.f32.gmra.mrb[14].mxu0 %v2342_v21  ;;  %v1957_v57 = vpack.c.bf16 %v383_v51, %v358_v49  ;;  %v1959_v63 = vpack.c.bf16 %v434_v55, %v409_v54  ;;  %v190_v43 = vld [vmem:[#allocation5 + $0x480] sm:$0xff]  ;;  %v189_v49 = vld [vmem:[#allocation5 + $0x478] sm:$0xff]  ;;  %v240_v54 = vld [vmem:[#allocation5 + $0x610] sm:$0xff] }
  0x9d   :  { %1938 = vmatpush1.bf16.msra.mxu0 %v1937_v56  ;;  %1690 = vmatprep.mubr.msk.f32.mxu0 %vm496_vm0, %v2347_v29  ;;  %v1993_v56 = vpack.c.bf16 %v385_v48, %v360_v47  ;;  %v2047_v47 = vpack.c.bf16 %v190_v43, %v165_v42  ;;  %v164_v48 = vld [vmem:[#allocation5 + $0x3b0] sm:$0xff]  ;;  %v213_v55 = vld [vmem:[#allocation5 + $0x538] sm:$0xff]  ;;  %v438_v42 = vld [vmem:[#allocation5 + $0xc40] sm:$0xff] }
  0x9e   :  { %1940 = vmatprep.subr.bf16.mxu0 %v1939_v62  ;;  %998 = vmatmul.mubr.f32.gmra.mrb[16].mxu1 %v2352_v36  ;;  %v408_v62 = vld [vmem:[#allocation5 + $0xb50] sm:$0xff] }
  0x9f   :  { %1978 = vmatpush1.bf16.msra.mxu1 %v1977_v4  ;;  %1697 = vmatprep.mubr.msk.f32.mxu1 %vm496_vm0, %v2328_v22  ;;  %v484_v4 = vld [vmem:[#allocation5 + $0xdb0] sm:$0xff] }
  0xa0   :  { %1980 = vmatprep.subr.bf16.mxu1 %v1979_v6  ;;  %915 = vmatmul.mubr.f32.gmra.mrb[16].mxu0 %v2352_v36  ;;  %v1961_v6 = vpack.c.bf16 %v433_v0, %v408_v62  ;;  %v1963_v11 = vpack.c.bf16 %v484_v4, %v459_v3  ;;  %v212_v62 = vld [vmem:[#allocation5 + $0x530] sm:$0xff]  ;;  %v237_v0 = vld [vmem:[#allocation5 + $0x5f8] sm:$0xff] }
  0xa1   :  { %1942 = vmatpush1.bf16.msra.mxu0 %v1941_v5  ;;  %1694 = vmatprep.mubr.msk.f32.mxu0 %vm496_vm0, %v2328_v22  ;;  %v1953_v22 = vpack.c.bf16 %v333_v40, %v308_v38  ;;  %v1997_v5 = vpack.c.bf16 %v435_v61, %v410_v60  ;;  %v139_v38 = vld [vmem:[#allocation5 + $0x2e8] sm:$0xff]  ;;  %v214_v60 = vld [vmem:[#allocation5 + $0x540] sm:$0xff]  ;;  %v288_v3 = vld [vmem:[#allocation5 + $0x790] sm:$0xff] }
  0xa2   :  { %1944 = vmatprep.subr.bf16.mxu0 %v1943_v10  ;;  %v458_v10 = vld [vmem:[#allocation5 + $0xce0] sm:$0xff]  ;;  %v239_v61 = vld [vmem:[#allocation5 + $0x608] sm:$0xff] }
  0xa3   :  { %1982 = vmatpush1.bf16.msra.mxu1 %v1981_v16  ;;  %v88_v16 = vld [vmem:[#allocation5 + $0x150] sm:$0xff]  ;;  %v2053_v4 = vpack.c.bf16 %v239_v61, %v214_v60  ;;  %v487_v61 = vld [vmem:[#allocation5 + $0xdc8] sm:$0xff] }
  0xa4   :  { %1984 = vmatprep.subr.bf16.mxu1 %v1983_v19  ;;  %v1965_v19 = vpack.c.bf16 %v483_v12, %v458_v10  ;;  %v2003_v26 = vpack.c.bf16 %v88_v16, %v63_v15  ;;  %v315_v12 = vld [vmem:[#allocation5 + $0x868] sm:$0xff] }
  0xa5   :  { %1946 = vmatpush1.bf16.msra.mxu0 %v1945_v17  ;;  %v2001_v17 = vpack.c.bf16 %v485_v9, %v460_v8  ;;  %v264_v8 = vld [vmem:[#allocation5 + $0x6d0] sm:$0xff]  ;;  %v262_v9 = vld [vmem:[#allocation5 + $0x6c0] sm:$0xff] }
  0xa6   :  { %1948 = vmatprep.subr.bf16.mxu0 %v1947_v25  ;;  %v62_v25 = vld [vmem:[#allocation5 + $0x80] sm:$0xff] }
  0xa7   :  { %1986 = vmatpush1.bf16.msra.mxu1 %v1985_v32  ;;  %v138_v32 = vld [vmem:[#allocation5 + $0x2e0] sm:$0xff] }
  0xa8   :  { %1988 = vmatprep.subr.bf16.mxu1 %v1987_v34  ;;  %v2005_v34 = vpack.c.bf16 %v87_v27, %v62_v25  ;;  %v2007_v40 = vpack.c.bf16 %v138_v32, %v113_v31  ;;  %v337_v25 = vld [vmem:[#allocation5 + $0x918] sm:$0xff]  ;;  %v390_v27 = vld [vmem:[#allocation5 + $0xac0] sm:$0xff] }
  0xa9   :  { %1950 = vmatpush1.bf16.msra.mxu0 %v1949_v33  ;;  %v2041_v33 = vpack.c.bf16 %v89_v24, %v64_v23  ;;  %v312_v23 = vld [vmem:[#allocation5 + $0x850] sm:$0xff] }
  0xaa   :  { %1952 = vmatprep.subr.bf16.mxu0 %v1951_v39  ;;  %v112_v39 = vld [vmem:[#allocation5 + $0x210] sm:$0xff]  ;;  %v2025_v31 = vpack.c.bf16 %v337_v25, %v312_v23  ;;  %v169_v23 = vld [vmem:[#allocation5 + $0x3d8] sm:$0xff] }
  0xab   :  { %1990 = vmatpush1.bf16.msra.mxu1 %v1989_v45  ;;  %v188_v45 = vld [vmem:[#allocation5 + $0x470] sm:$0xff] }
  0xac   :  { %1992 = vmatprep.subr.bf16.mxu1 %v1991_v46  ;;  %v2009_v46 = vpack.c.bf16 %v137_v41, %v112_v39  ;;  %v2011_v51 = vpack.c.bf16 %v188_v45, %v163_v44  ;;  %v415_v39 = vld [vmem:[#allocation5 + $0xb88] sm:$0xff]  ;;  %v413_v41 = vld [vmem:[#allocation5 + $0xb78] sm:$0xff]  ;;  %v2418_v25 = vld [vmem:[#allocation2] sm:$0xff] }
  0xad   :  { %1954 = vmatpush1.bf16.msra.mxu0 %v1953_v22  ;;  %v2045_v22 = vpack.c.bf16 %v139_v38, %v114_v37  ;;  %v387_v38 = vld [vmem:[#allocation5 + $0xaa8] sm:$0xff] }
  0xae   :  { %1956 = vmatprep.subr.bf16.mxu0 %v1955_v50  ;;  %v162_v50 = vld [vmem:[#allocation5 + $0x3a0] sm:$0xff] }
  0xaf   :  { %1994 = vmatpush1.bf16.msra.mxu1 %v1993_v56  ;;  %v238_v56 = vld [vmem:[#allocation5 + $0x600] sm:$0xff] }
  0xb0   :  { %1996 = vmatprep.subr.bf16.mxu1 %v1995_v58  ;;  %v2051_v58 = vpack.c.bf16 %v240_v54, %v215_v53  ;;  %v488_v53 = vld [vmem:[#allocation5 + $0xdd0] sm:$0xff] }
  0xb1   :  { %1958 = vmatpush1.bf16.msra.mxu0 %v1957_v57  ;;  %v2013_v57 = vpack.c.bf16 %v187_v52, %v162_v50  ;;  %v465_v50 = vld [vmem:[#allocation5 + $0xd18] sm:$0xff]  ;;  %v463_v52 = vld [vmem:[#allocation5 + $0xd08] sm:$0xff] }
  0xb2   :  { %1960 = vmatprep.subr.bf16.mxu0 %v1959_v63  ;;  %v2015_v63 = vpack.c.bf16 %v238_v56, %v213_v55  ;;  %v2035_v60 = vpack.c.bf16 %v488_v53, %v463_v52  ;;  %v294_v52 = vld [vmem:[#allocation5 + $0x7c0] sm:$0xff]  ;;  %v267_v53 = vld [vmem:[#allocation5 + $0x6e8] sm:$0xff] }
  0xb3   :  { %1998 = vmatpush1.bf16.msra.mxu1 %v1997_v5  ;;  %v2411_v5 = vld [vmem:[#allocation2 + $0x8] sm:$0xff] }
  0xb4   :  { %2000 = vmatprep.subr.bf16.mxu1 %v1999_v7  ;;  %v2055_v7 = vpack.c.bf16 %v290_v2, %v265_v1  ;;  %v92_v1 = vld [vmem:[#allocation5 + $0x170] sm:$0xff] }
  0xb5   :  { %1962 = vmatpush1.bf16.msra.mxu0 %v1961_v6  ;;  %v2017_v6 = vpack.c.bf16 %v237_v0, %v212_v62  ;;  %v69_v62 = vld [vmem:[#allocation5 + $0xb8] sm:$0xff]  ;;  %v67_v0 = vld [vmem:[#allocation5 + $0xa8] sm:$0xff] }
  0xb6   :  { %1964 = vmatprep.subr.bf16.mxu0 %v1963_v11  ;;  %v287_v11 = vld [vmem:[#allocation5 + $0x788] sm:$0xff] }
  0xb7   :  { %2002 = vmatpush1.bf16.msra.mxu1 %v2001_v17  ;;  %v2021_v16 = vpack.c.bf16 %v287_v11, %v262_v9  ;;  %v2059_v17 = vpack.c.bf16 %v340_v13, %v315_v12  ;;  %v119_v9 = vld [vmem:[#allocation5 + $0x248] sm:$0xff]  ;;  %v117_v11 = vld [vmem:[#allocation5 + $0x238] sm:$0xff]  ;;  %v142_v12 = vld [vmem:[#allocation5 + $0x300] sm:$0xff] }
  0xb8   :  { %2040 = vmatprep.subr.bf16.mxu1 %v2039_v20  ;;  %v339_v20 = vld [vmem:[#allocation5 + $0x928] sm:$0xff] }
  0xb9   :  { %1966 = vmatpush1.bf16.msra.mxu0 %v1965_v19  ;;  %v314_v19 = vld [vmem:[#allocation5 + $0x860] sm:$0xff] }
  0xba   :  { %2004 = vmatprep.subr.bf16.mxu0 %v2003_v26  ;;  %1152 = vmatmul.mubr.f32.vlgmr.msra.gmra.mrb[18].mxu1 %v2334_v59  ;;  %v365_v26 = vld [vmem:[#allocation5 + $0x9f8] sm:$0xff]  ;;  %v2061_v30 = vpack.c.bf16 %v339_v20, %v314_v19  ;;  %v2079_v19 = vpack.c.bf16 %v142_v12, %v117_v11  ;;  %v394_v12 = vld [vmem:[#allocation5 + $0xae0] sm:$0xff] }
  0xbb   :  { %2042 = vmatpush1.bf16.msra.mxu1 %v2041_v33  ;;  %1698 = vmatprep.mubr.msk.f32.mxu1 %vm496_vm0, %v2338_v18  ;;  %v2063_v32 = vpack.c.bf16 %v390_v27, %v365_v26  ;;  %v364_v33 = vld [vmem:[#allocation5 + $0x9f0] sm:$0xff]  ;;  %v141_v20 = vld [vmem:[#allocation5 + $0x2f8] sm:$0xff]  ;;  %v167_v26 = vld [vmem:[#allocation5 + $0x3c8] sm:$0xff] }
  0xbc   :  { %1069 = vmatmul.mubr.f32.vlgmr.msra.gmra.mrb[18].mxu0 %v2334_v59  ;;  %2044 = vmatprep.subr.bf16.mxu1 %v2043_v35  ;;  %v2049_v59 = vpack.c.bf16 %v189_v49, %v164_v48  ;;  %v362_v35 = vld [vmem:[#allocation5 + $0x9e0] sm:$0xff]  ;;  %v2031_v48 = vpack.c.bf16 %v438_v42, %v413_v41  ;;  %v437_v49 = vld [vmem:[#allocation5 + $0xc38] sm:$0xff]  ;;  %v192_v27 = vld [vmem:[#allocation5 + $0x490] sm:$0xff] }
  0xbd   :  { %2006 = vmatpush1.bf16.msra.mxu0 %v2005_v34  ;;  %1695 = vmatprep.mubr.msk.f32.mxu0 %vm496_vm0, %v2338_v18  ;;  %v263_v18 = vld [vmem:[#allocation5 + $0x6c8] sm:$0xff]  ;;  %v389_v34 = vld [vmem:[#allocation5 + $0xab8] sm:$0xff]  ;;  %v2029_v44 = vpack.c.bf16 %v387_v38, %v362_v35  ;;  %v244_v38 = vld [vmem:[#allocation5 + $0x630] sm:$0xff] }
  0xbe   :  { %2008 = vmatprep.subr.bf16.mxu0 %v2007_v40  ;;  %1158 = vmatmul.mubr.f32.gmra.mrb[20].mxu1 %v2342_v21  ;;  %v2019_v10 = vpack.c.bf16 %v288_v3, %v263_v18  ;;  %v440_v40 = vld [vmem:[#allocation5 + $0xc50] sm:$0xff]  ;;  %v2065_v43 = vpack.c.bf16 %v389_v34, %v364_v33  ;;  %v166_v33 = vld [vmem:[#allocation5 + $0x3c0] sm:$0xff]  ;;  %v2083_v34 = vpack.c.bf16 %v192_v27, %v167_v26  ;;  %v191_v35 = vld [vmem:[#allocation5 + $0x488] sm:$0xff] }
  0xbf   :  { %2046 = vmatpush1.bf16.msra.mxu1 %v2045_v22  ;;  %1699 = vmatprep.mubr.msk.f32.mxu1 %vm496_vm0, %v2347_v29  ;;  %v2067_v45 = vpack.c.bf16 %v440_v40, %v415_v39  ;;  %v414_v22 = vld [vmem:[#allocation5 + $0xb80] sm:$0xff]  ;;  %v2422_v39 = vld [vmem:[#allocation2 + $0x18] sm:$0xff]  ;;  %v217_v40 = vld [vmem:[#allocation5 + $0x558] sm:$0xff] }
  0xc0   :  { %2048 = vmatprep.subr.bf16.mxu1 %v2047_v47  ;;  %1075 = vmatmul.mubr.f32.gmra.mrb[20].mxu0 %v2342_v21  ;;  %v289_v21 = vld [vmem:[#allocation5 + $0x798] sm:$0xff]  ;;  %v412_v47 = vld [vmem:[#allocation5 + $0xb70] sm:$0xff]  ;;  %v242_v41 = vld [vmem:[#allocation5 + $0x620] sm:$0xff] }
  0xc1   :  { %2010 = vmatpush1.bf16.msra.mxu0 %v2009_v46  ;;  %1696 = vmatprep.mubr.msk.f32.mxu0 %vm496_vm0, %v2347_v29  ;;  %v313_v29 = vld [vmem:[#allocation5 + $0x858] sm:$0xff]  ;;  %v2057_v15 = vpack.c.bf16 %v289_v21, %v264_v8  ;;  %v439_v46 = vld [vmem:[#allocation5 + $0xc48] sm:$0xff]  ;;  %v2033_v55 = vpack.c.bf16 %v437_v49, %v412_v47  ;;  %v2075_v8 = vpack.c.bf16 %v92_v1, %v67_v0  ;;  %v2426_v42 = vld [vmem:[#allocation2 + $0x10] sm:$0xff] }
  0xc2   :  { %2012 = vmatprep.subr.bf16.mxu0 %v2011_v51  ;;  %1164 = vmatmul.mubr.f32.gmra.mrb[22].mxu1 %v2352_v36  ;;  %v2023_v24 = vpack.c.bf16 %v338_v14, %v313_v29  ;;  %v490_v51 = vld [vmem:[#allocation5 + $0xde0] sm:$0xff]  ;;  %v2069_v54 = vpack.c.bf16 %v439_v46, %v414_v22  ;;  %v91_v21 = vld [vmem:[#allocation5 + $0x168] sm:$0xff]  ;;  %v2087_v49 = vpack.c.bf16 %v242_v41, %v217_v40  ;;  %v344_v1 = vld [vmem:[#allocation5 + $0x950] sm:$0xff] }
  0xc3   :  { %2050 = vmatpush1.bf16.msra.mxu1 %v2049_v59  ;;  %1703 = vmatprep.mubr.msk.f32.mxu1 %vm496_vm0, %v2411_v5  ;;  %v2071_v56 = vpack.c.bf16 %v490_v51, %v465_v50  ;;  %v464_v59 = vld [vmem:[#allocation5 + $0xd10] sm:$0xff]  ;;  %v218_v46 = vld [vmem:[#allocation5 + $0x560] sm:$0xff]  ;;  %v243_v47 = vld [vmem:[#allocation5 + $0x628] sm:$0xff] }
  0xc4   :  { %2052 = vmatprep.subr.bf16.mxu1 %v2051_v58  ;;  %1081 = vmatmul.mubr.f32.gmra.mrb[22].mxu0 %v2352_v36  ;;  %v363_v36 = vld [vmem:[#allocation5 + $0x9e8] sm:$0xff]  ;;  %v462_v58 = vld [vmem:[#allocation5 + $0xd00] sm:$0xff]  ;;  %v241_v50 = vld [vmem:[#allocation5 + $0x618] sm:$0xff] }
  0xc5   :  { %2014 = vmatpush1.bf16.msra.mxu0 %v2013_v57  ;;  %1700 = vmatprep.mubr.msk.f32.mxu0 %vm496_vm0, %v2411_v5  ;;  %v2027_v37 = vpack.c.bf16 %v388_v28, %v363_v36  ;;  %v489_v57 = vld [vmem:[#allocation5 + $0xdd8] sm:$0xff]  ;;  %v2037_v18 = vpack.c.bf16 %v487_v61, %v462_v58  ;;  %v268_v58 = vld [vmem:[#allocation5 + $0x6f0] sm:$0xff]  ;;  %v266_v61 = vld [vmem:[#allocation5 + $0x6e0] sm:$0xff] }
  0xc6   :  { %2016 = vmatprep.subr.bf16.mxu0 %v2015_v63  ;;  %v94_v63 = vld [vmem:[#allocation5 + $0x180] sm:$0xff]  ;;  %v2073_v2 = vpack.c.bf16 %v489_v57, %v464_v59  ;;  %v269_v51 = vld [vmem:[#allocation5 + $0x6f8] sm:$0xff]  ;;  %v319_v0 = vld [vmem:[#allocation5 + $0x888] sm:$0xff] }
  0xc7   :  { %2054 = vmatpush1.bf16.msra.mxu1 %v2053_v4  ;;  %v2111_v3 = vpack.c.bf16 %v94_v63, %v69_v62  ;;  %v68_v4 = vld [vmem:[#allocation5 + $0xb0] sm:$0xff]  ;;  %v2127_v57 = vpack.c.bf16 %v294_v52, %v269_v51  ;;  %v291_v63 = vld [vmem:[#allocation5 + $0x7a8] sm:$0xff]  ;;  %v369_v11 = vld [vmem:[#allocation5 + $0xa18] sm:$0xff] }
  0xc8   :  { %2056 = vmatprep.subr.bf16.mxu1 %v2055_v7  ;;  %v66_v7 = vld [vmem:[#allocation5 + $0xa0] sm:$0xff]  ;;  %v419_v26 = vld [vmem:[#allocation5 + $0xba8] sm:$0xff]  ;;  %v444_v27 = vld [vmem:[#allocation5 + $0xc70] sm:$0xff] }
  0xc9   :  { %2018 = vmatpush1.bf16.msra.mxu0 %v2017_v6  ;;  %v93_v6 = vld [vmem:[#allocation5 + $0x178] sm:$0xff]  ;;  %v2077_v29 = vpack.c.bf16 %v91_v21, %v66_v7  ;;  %v318_v7 = vld [vmem:[#allocation5 + $0x880] sm:$0xff]  ;;  %v316_v21 = vld [vmem:[#allocation5 + $0x870] sm:$0xff] }
  0xca   :  { %2020 = vmatprep.subr.bf16.mxu0 %v2019_v10  ;;  %v144_v10 = vld [vmem:[#allocation5 + $0x310] sm:$0xff]  ;;  %v2113_v13 = vpack.c.bf16 %v93_v6, %v68_v4  ;;  %v2093_v4 = vpack.c.bf16 %v291_v63, %v266_v61  ;;  %v2131_v6 = vpack.c.bf16 %v344_v1, %v319_v0  ;;  %v469_v40 = vld [vmem:[#allocation5 + $0xd38] sm:$0xff]  ;;  %v494_v41 = vld [vmem:[#allocation5 + $0xe00] sm:$0xff] }
  0xcb   :  { %2058 = vmatpush1.bf16.msra.mxu1 %v2057_v15  ;;  %v2115_v14 = vpack.c.bf16 %v144_v10, %v119_v9  ;;  %v118_v15 = vld [vmem:[#allocation5 + $0x240] sm:$0xff]  ;;  %v341_v10 = vld [vmem:[#allocation5 + $0x938] sm:$0xff]  ;;  %v491_v52 = vld [vmem:[#allocation5 + $0xde8] sm:$0xff] }
  0xcc   :  { %2060 = vmatprep.subr.bf16.mxu1 %v2059_v17  ;;  %v116_v17 = vld [vmem:[#allocation5 + $0x230] sm:$0xff]  ;;  %v466_v51 = vld [vmem:[#allocation5 + $0xd20] sm:$0xff]  ;;  %v145_v61 = vld [vmem:[#allocation5 + $0x318] sm:$0xff] }
  0xcd   :  { %2022 = vmatpush1.bf16.msra.mxu0 %v2021_v16  ;;  %v143_v16 = vld [vmem:[#allocation5 + $0x308] sm:$0xff]  ;;  %v2081_v28 = vpack.c.bf16 %v141_v20, %v116_v17  ;;  %v368_v17 = vld [vmem:[#allocation5 + $0xa10] sm:$0xff]  ;;  %v366_v20 = vld [vmem:[#allocation5 + $0xa00] sm:$0xff] }
  0xce   :  { %2024 = vmatprep.subr.bf16.mxu0 %v2023_v24  ;;  %v194_v24 = vld [vmem:[#allocation5 + $0x4a0] sm:$0xff]  ;;  %v2117_v36 = vpack.c.bf16 %v143_v16, %v118_v15  ;;  %v2097_v15 = vpack.c.bf16 %v341_v10, %v316_v21  ;;  %v2135_v16 = vpack.c.bf16 %v394_v12, %v369_v11  ;;  %v195_v0 = vld [vmem:[#allocation5 + $0x4a8] sm:$0xff]  ;;  %v345_v21 = vld [vmem:[#allocation5 + $0x958] sm:$0xff] }
  0xcf   :  { %2062 = vmatpush1.bf16.msra.mxu1 %v2061_v30  ;;  %v2119_v30 = vpack.c.bf16 %v194_v24, %v169_v23  ;;  %v391_v24 = vld [vmem:[#allocation5 + $0xac8] sm:$0xff]  ;;  %v170_v63 = vld [vmem:[#allocation5 + $0x3e0] sm:$0xff]  ;;  %v420_v11 = vld [vmem:[#allocation5 + $0xbb0] sm:$0xff] }
  0xd0   :  { %2064 = vmatprep.subr.bf16.mxu1 %v2063_v32  ;;  %v193_v32 = vld [vmem:[#allocation5 + $0x498] sm:$0xff]  ;;  %v2154_v1 = vpack.c.bf16 %v195_v0, %v170_v63  ;;  %v395_v10 = vld [vmem:[#allocation5 + $0xae8] sm:$0xff] }
  0xd1   :  { %2026 = vmatpush1.bf16.msra.mxu0 %v2025_v31  ;;  %v168_v31 = vld [vmem:[#allocation5 + $0x3d0] sm:$0xff]  ;;  %v445_v12 = vld [vmem:[#allocation5 + $0xc78] sm:$0xff] }
  0xd2   :  { %2028 = vmatprep.subr.bf16.mxu0 %v2027_v37  ;;  %v219_v37 = vld [vmem:[#allocation5 + $0x568] sm:$0xff] }
  0xd3   :  { %2066 = vmatpush1.bf16.msra.mxu1 %v2065_v43  ;;  %v2121_v43 = vpack.c.bf16 %v193_v32, %v168_v31  ;;  %v2123_v22 = vpack.c.bf16 %v244_v38, %v219_v37  ;;  %v2101_v31 = vpack.c.bf16 %v391_v24, %v366_v20  ;;  %v2139_v32 = vpack.c.bf16 %v444_v27, %v419_v26  ;;  %v441_v38 = vld [vmem:[#allocation5 + $0xc58] sm:$0xff] }
  0xd4   :  { %2068 = vmatprep.subr.bf16.mxu1 %v2067_v45  ;;  %v2085_v45 = vpack.c.bf16 %v191_v35, %v166_v33  ;;  %v418_v33 = vld [vmem:[#allocation5 + $0xba0] sm:$0xff]  ;;  %v416_v35 = vld [vmem:[#allocation5 + $0xb90] sm:$0xff] }
  0xd5   :  { %2030 = vmatpush1.bf16.msra.mxu0 %v2029_v44  ;;  %v2431_v44 = vld [vmem:[#allocation2 + $0x28] sm:$0xff] }
  0xd6   :  { %2032 = vmatprep.subr.bf16.mxu0 %v2031_v48  ;;  %v216_v48 = vld [vmem:[#allocation5 + $0x550] sm:$0xff] }
  0xd7   :  { %2070 = vmatpush1.bf16.msra.mxu1 %v2069_v54  ;;  %v292_v54 = vld [vmem:[#allocation5 + $0x7b0] sm:$0xff]  ;;  %v2089_v59 = vpack.c.bf16 %v241_v50, %v216_v48 }
  0xd8   :  { %2072 = vmatprep.subr.bf16.mxu1 %v2071_v56  ;;  %v2125_v56 = vpack.c.bf16 %v243_v47, %v218_v46  ;;  %v2091_v62 = vpack.c.bf16 %v292_v54, %v267_v53  ;;  %v2105_v46 = vpack.c.bf16 %v441_v38, %v416_v35  ;;  %v2143_v47 = vpack.c.bf16 %v494_v41, %v469_v40  ;;  %v468_v48 = vld [vmem:[#allocation5 + $0xd30] sm:$0xff] }
  0xd9   :  { %2034 = vmatpush1.bf16.msra.mxu0 %v2033_v55  ;;  %v2436_v55 = vld [vmem:[#allocation2 + $0x20] sm:$0xff]  ;;  %v2109_v54 = vpack.c.bf16 %v491_v52, %v466_v51 }
  0xda   :  { %2036 = vmatprep.subr.bf16.mxu0 %v2035_v60  ;;  %v293_v60 = vld [vmem:[#allocation5 + $0x7b8] sm:$0xff] }
  0xdb   :  { %2074 = vmatpush1.bf16.msra.mxu1 %v2073_v2  ;;  %v317_v2 = vld [vmem:[#allocation5 + $0x878] sm:$0xff] }
  0xdc   :  { %2112 = vmatprep.subr.bf16.mxu1 %v2111_v3  ;;  %v2129_v3 = vpack.c.bf16 %v293_v60, %v268_v58  ;;  %v2284_v58 = vmov 0.0|0.0   ;;  %v120_v60 = vld [vmem:[#allocation5 + $0x250] sm:$0xff] }
  0xdd   :  { %2038 = vmatpush1.bf16.msra.mxu0 %v2037_v18  ;;  %v342_v18 = vld [vmem:[#allocation5 + $0x940] sm:$0xff] }
  0xde   :  { %2076 = vmatprep.subr.bf16.mxu0 %v2075_v8  ;;  %1318 = vmatmul.mubr.f32.vlgmr.msra.gmra.mrb[24].mxu1 %v2418_v25  ;;  %v343_v8 = vld [vmem:[#allocation5 + $0x948] sm:$0xff]  ;;  %v2095_v9 = vpack.c.bf16 %v342_v18, %v317_v2  ;;  %v220_v2 = vld [vmem:[#allocation5 + $0x570] sm:$0xff]  ;;  %v245_v18 = vld [vmem:[#allocation5 + $0x638] sm:$0xff] }
  0xdf   :  { %2114 = vmatpush1.bf16.msra.mxu1 %v2113_v13  ;;  %1704 = vmatprep.mubr.msk.f32.mxu1 %vm496_vm0, %v2422_v39  ;;  %v367_v13 = vld [vmem:[#allocation5 + $0xa08] sm:$0xff] }
  0xe0   :  { %1235 = vmatmul.mubr.f32.vlgmr.msra.gmra.mrb[24].mxu0 %v2418_v25  ;;  %2116 = vmatprep.subr.bf16.mxu1 %v2115_v14  ;;  %v2133_v14 = vpack.c.bf16 %v343_v8, %v318_v7  ;;  %v320_v8 = vld [vmem:[#allocation5 + $0x890] sm:$0xff] }
  0xe1   :  { %2078 = vmatpush1.bf16.msra.mxu0 %v2077_v29  ;;  %1701 = vmatprep.mubr.msk.f32.mxu0 %vm496_vm0, %v2422_v39  ;;  %v392_v29 = vld [vmem:[#allocation5 + $0xad0] sm:$0xff] }
  0xe2   :  { %2080 = vmatprep.subr.bf16.mxu0 %v2079_v19  ;;  %1324 = vmatmul.mubr.f32.gmra.mrb[26].mxu1 %v2426_v42  ;;  %v393_v19 = vld [vmem:[#allocation5 + $0xad8] sm:$0xff]  ;;  %v2099_v23 = vpack.c.bf16 %v392_v29, %v367_v13  ;;  %v2169_v13 = vpack.c.bf16 %v445_v12, %v420_v11  ;;  %v470_v29 = vld [vmem:[#allocation5 + $0xd40] sm:$0xff] }
  0xe3   :  { %2118 = vmatpush1.bf16.msra.mxu1 %v2117_v36  ;;  %1705 = vmatprep.mubr.msk.f32.mxu1 %vm496_vm0, %v2431_v44  ;;  %v417_v36 = vld [vmem:[#allocation5 + $0xb98] sm:$0xff] }
  0xe4   :  { %2120 = vmatprep.subr.bf16.mxu1 %v2119_v30  ;;  %1241 = vmatmul.mubr.f32.gmra.mrb[26].mxu0 %v2426_v42  ;;  %v2137_v30 = vpack.c.bf16 %v393_v19, %v368_v17 }
  0xe5   :  { %2082 = vmatpush1.bf16.msra.mxu0 %v2081_v28  ;;  %1702 = vmatprep.mubr.msk.f32.mxu0 %vm496_vm0, %v2431_v44  ;;  %v442_v28 = vld [vmem:[#allocation5 + $0xc60] sm:$0xff] }
  0xe6   :  { %2084 = vmatprep.subr.bf16.mxu0 %v2083_v34  ;;  %1330 = vmatmul.mubr.f32.gmra.mrb[28].mxu1 %v2436_v55  ;;  %v443_v34 = vld [vmem:[#allocation5 + $0xc68] sm:$0xff]  ;;  %v2103_v37 = vpack.c.bf16 %v442_v28, %v417_v36 }
  0xe7   :  { %2122 = vmatpush1.bf16.msra.mxu1 %v2121_v43  ;;  %1709 = vmatprep.mubr.msk.f32.mxu1 %vm496_vm0, %v2411_v5  ;;  %v467_v43 = vld [vmem:[#allocation5 + $0xd28] sm:$0xff] }
  0xe8   :  { %2124 = vmatprep.subr.bf16.mxu1 %v2123_v22  ;;  %1247 = vmatmul.mubr.f32.gmra.mrb[28].mxu0 %v2436_v55  ;;  %v2141_v22 = vpack.c.bf16 %v443_v34, %v418_v33 }
  0xe9   :  { %2086 = vmatpush1.bf16.msra.mxu0 %v2085_v45  ;;  %1706 = vmatprep.mubr.msk.f32.mxu0 %vm496_vm0, %v2411_v5  ;;  %v492_v45 = vld [vmem:[#allocation5 + $0xdf0] sm:$0xff] }
  0xea   :  { %2088 = vmatprep.subr.bf16.mxu0 %v2087_v49  ;;  %v493_v49 = vld [vmem:[#allocation5 + $0xdf8] sm:$0xff]  ;;  %v2107_v50 = vpack.c.bf16 %v492_v45, %v467_v43 }
  0xeb   :  { %2126 = vmatpush1.bf16.msra.mxu1 %v2125_v56  ;;  %v2145_v53 = vpack.c.bf16 %v493_v49, %v468_v48  ;;  %v70_v56 = vld [vmem:[#allocation5 + $0xc0] sm:$0xff] }
  0xec   :  { %2128 = vmatprep.subr.bf16.mxu1 %v2127_v57 }
  0xed   :  { %2090 = vmatpush1.bf16.msra.mxu0 %v2089_v59  ;;  %v95_v59 = vld [vmem:[#allocation5 + $0x188] sm:$0xff] }
  0xee   :  { %2092 = vmatprep.subr.bf16.mxu0 %v2091_v62  ;;  %v2148_v57 = vpack.c.bf16 %v95_v59, %v70_v56  ;;  %v2151_v62 = vpack.c.bf16 %v145_v61, %v120_v60 }
  0xef   :  { %2130 = vmatpush1.bf16.msra.mxu1 %v2129_v3  ;;  %v2157_v3 = vpack.c.bf16 %v245_v18, %v220_v2 }
  0xf0   :  { %2132 = vmatprep.subr.bf16.mxu1 %v2131_v6  ;;  %v295_v6 = vld [vmem:[#allocation5 + $0x7c8] sm:$0xff] }
  0xf1   :  { %2094 = vmatpush1.bf16.msra.mxu0 %v2093_v4  ;;  %v270_v4 = vld [vmem:[#allocation5 + $0x700] sm:$0xff] }
  0xf2   :  { %2096 = vmatprep.subr.bf16.mxu0 %v2095_v9  ;;  %v2160_v7 = vpack.c.bf16 %v295_v6, %v270_v4  ;;  %v370_v9 = vld [vmem:[#allocation5 + $0xa20] sm:$0xff] }
  0xf3   :  { %2134 = vmatpush1.bf16.msra.mxu1 %v2133_v14  ;;  %v495_v14 = vld [vmem:[#allocation5 + $0xe08] sm:$0xff] }
  0xf4   :  { %2136 = vmatprep.subr.bf16.mxu1 %v2135_v16 }
  0xf5   :  { %2098 = vmatpush1.bf16.msra.mxu0 %v2097_v15  ;;  %v2172_v15 = vpack.c.bf16 %v495_v14, %v470_v29 }
  0xf6   :  { %2100 = vmatprep.subr.bf16.mxu0 %v2099_v23 }
  0xf7   :  { %2138 = vmatpush1.bf16.msra.mxu1 %v2137_v30 }
  0xf8   :  { %2140 = vmatprep.subr.bf16.mxu1 %v2139_v32 }
  0xf9   :  { %2102 = vmatpush1.bf16.msra.mxu0 %v2101_v31 }
  0xfa   :  { %2104 = vmatprep.subr.bf16.mxu0 %v2103_v37 }
  0xfb   :  { %2142 = vmatpush1.bf16.msra.mxu1 %v2141_v22 }
  0xfc   :  { %2144 = vmatprep.subr.bf16.mxu1 %v2143_v47 }
  0xfd   :  { %2106 = vmatpush1.bf16.msra.mxu0 %v2105_v46 }
  0xfe   :  { %2108 = vmatprep.subr.bf16.mxu0 %v2107_v50 }
  0xff   :  { %2146 = vmatpush1.bf16.msra.mxu1 %v2145_v53 }
 0x100   :  { %2174 = vmatprep.subr.bf16.mxu1 %v2284_v58 }
 0x101   :  { %2110 = vmatpush1.bf16.msra.mxu0 %v2109_v54 }
 0x102   :  { %2147 = vmatprep.subr.bf16.mxu0 %v2284_v58  ;;  %1484 = vmatmul.mubr.f32.vlgmr.msra.gmra.mrb[30].mxu1 %v2418_v25 }
 0x103   :  { %2183 = vmatpush1.bf16.msra.mxu1 %v2148_v57  ;;  %1710 = vmatprep.mubr.msk.f32.mxu1 %vm496_vm0, %v2422_v39 }
 0x104   :  { %1401 = vmatmul.mubr.f32.vlgmr.msra.gmra.mrb[30].mxu0 %v2418_v25  ;;  %2175 = vmatprep.subr.bf16.mxu1 %v2284_v58 }
 0x105   :  { %2149 = vmatpush1.bf16.msra.mxu0 %v2148_v57  ;;  %1707 = vmatprep.mubr.msk.f32.mxu0 %vm496_vm0, %v2422_v39 }
 0x106   :  { %2150 = vmatprep.subr.bf16.mxu0 %v2284_v58  ;;  %1490 = vmatmul.mubr.f32.gmra.mrb[32].mxu1 %v2426_v42 }
 0x107   :  { %2184 = vmatpush1.bf16.msra.mxu1 %v2151_v62  ;;  %1711 = vmatprep.mubr.msk.f32.mxu1 %vm496_vm0, %v2431_v44 }
 0x108   :  { %2176 = vmatprep.subr.bf16.mxu1 %v2284_v58  ;;  %1407 = vmatmul.mubr.f32.gmra.mrb[32].mxu0 %v2426_v42 }
 0x109   :  { %2152 = vmatpush1.bf16.msra.mxu0 %v2151_v62  ;;  %1708 = vmatprep.mubr.msk.f32.mxu0 %vm496_vm0, %v2431_v44 }
 0x10a   :  { %2153 = vmatprep.subr.bf16.mxu0 %v2284_v58  ;;  %1496 = vmatmul.mubr.f32.gmra.mrb[34].mxu1 %v2436_v55 }
 0x10b   :  { %2185 = vmatpush1.bf16.msra.mxu1 %v2154_v1  ;;  %1713 = vmatprep.mubr.msk.f32.mxu1 %vm496_vm0, %v2422_v39  ;;  %v2163_v39 = vpack.c.bf16 %v345_v21, %v320_v8 }
 0x10c   :  { %2177 = vmatprep.subr.bf16.mxu1 %v2284_v58  ;;  %1413 = vmatmul.mubr.f32.gmra.mrb[34].mxu0 %v2436_v55 }
 0x10d   :  { %2155 = vmatpush1.bf16.msra.mxu0 %v2154_v1  ;;  %1712 = vmatprep.mubr.msk.f32.mxu0 %vm496_vm0, %v2411_v5  ;;  %v2166_v5 = vpack.c.bf16 %v395_v10, %v370_v9 }
 0x10e   :  { %2156 = vmatprep.subr.bf16.mxu0 %v2284_v58 }
 0x10f   :  { %2186 = vmatpush1.bf16.msra.mxu1 %v2157_v3 }
 0x110   :  { %2178 = vmatprep.subr.bf16.mxu1 %v2284_v58 }
 0x111   :  { %2158 = vmatpush1.bf16.msra.mxu0 %v2157_v3 }
 0x112   :  { %2159 = vmatprep.subr.bf16.mxu0 %v2284_v58 }
 0x113   :  { %2187 = vmatpush1.bf16.msra.mxu1 %v2160_v7 }
 0x114   :  { %2179 = vmatprep.subr.bf16.mxu1 %v2284_v58 }
 0x115   :  { %2161 = vmatpush1.bf16.msra.mxu0 %v2160_v7 }
 0x116   :  { %2162 = vmatprep.subr.bf16.mxu0 %v2284_v58 }
 0x117   :  { %2188 = vmatpush1.bf16.msra.mxu1 %v2163_v39 }
 0x118   :  { %2180 = vmatprep.subr.bf16.mxu1 %v2284_v58 }
 0x119   :  { %2164 = vmatpush1.bf16.msra.mxu0 %v2163_v39 }
 0x11a   :  { %2165 = vmatprep.subr.bf16.mxu0 %v2284_v58 }
 0x11b   :  { %2189 = vmatpush1.bf16.msra.mxu1 %v2166_v5 }
 0x11c   :  { %2181 = vmatprep.subr.bf16.mxu1 %v2284_v58 }
 0x11d   :  { %2167 = vmatpush1.bf16.msra.mxu0 %v2166_v5 }
 0x11e   :  { %2168 = vmatprep.subr.bf16.mxu0 %v2284_v58 }
 0x11f   :  { %2190 = vmatpush1.bf16.msra.mxu1 %v2169_v13 }
 0x120   :  { %2182 = vmatprep.subr.bf16.mxu1 %v2284_v58 }
 0x121   :  { %2170 = vmatpush1.bf16.msra.mxu0 %v2169_v13  ;;  %v655_v16 = vpop.f32.mrb[0].mxu1 }
 0x122   :  { %2171 = vmatprep.subr.bf16.mxu0 %v2284_v58  ;;  %1584 = vst [vmem:[#allocation7 + $0x10] sm:$0xff] %v655_v16  ;;  %v657_v17 = vpop.f32.mrb[1].mxu1 }
 0x123   :  { %v572_v19 = vpop.f32.mrb[0].mxu0  ;;  %1585 = vst [vmem:[#allocation7 + $0x18] sm:$0xff] %v657_v17  ;;  %2191 = vmatpush1.bf16.msra.mxu1 %v2172_v15 }
 0x124   :  { %1582 = vst [vmem:[#allocation7] sm:$0xff] %v572_v19  ;;  %v574_v20 = vpop.f32.mrb[1].mxu0 }
 0x125   :  { %1583 = vst [vmem:[#allocation7 + $0x8] sm:$0xff] %v574_v20  ;;  %2173 = vmatpush1.bf16.msra.mxu0 %v2172_v15  ;;  %v661_v26 = vpop.f32.mrb[2].mxu1 }
 0x126   :  { %1572 = vmatmul.mubr.f32.vlgmr.msra.gmra.mrb[36].mxu1 %v2426_v42  ;;  %1610 = vst [vmem:[#allocation7 + $0xd8] sm:$0xff] %v661_v26  ;;  %v663_v27 = vpop.f32.mrb[3].mxu1 }
 0x127   :  { %v578_v23 = vpop.f32.mrb[2].mxu0  ;;  %1714 = vmatprep.mubr.msk.f32.mxu1 %vm496_vm0, %v2431_v44  ;;  %1611 = vst [vmem:[#allocation7 + $0xe0] sm:$0xff] %v663_v27 }
 0x128   :  { %1567 = vmatmul.mubr.f32.vlgmr.msra.gmra.mrb[36].mxu0 %v2418_v25  ;;  %1608 = vst [vmem:[#allocation7 + $0xc8] sm:$0xff] %v578_v23  ;;  %v580_v24 = vpop.f32.mrb[3].mxu0 }
 0x129   :  { %1609 = vst [vmem:[#allocation7 + $0xd0] sm:$0xff] %v580_v24  ;;  %v667_v30 = vpop.f32.mrb[4].mxu1 }
 0x12a   :  { %1577 = vmatmul.mubr.f32.gmra.mrb[38].mxu1 %v2436_v55  ;;  %1635 = vst [vmem:[#allocation7 + $0x1a0] sm:$0xff] %v667_v30  ;;  %v669_v42 = vpop.f32.mrb[5].mxu1 }
 0x12b   :  { %v584_v36 = vpop.f32.mrb[4].mxu0  ;;  %1636 = vst [vmem:[#allocation7 + $0x1a8] sm:$0xff] %v669_v42 }
 0x12c   :  { %1633 = vst [vmem:[#allocation7 + $0x190] sm:$0xff] %v584_v36  ;;  %v586_v28 = vpop.f32.mrb[5].mxu0 }
 0x12d   :  { %1634 = vst [vmem:[#allocation7 + $0x198] sm:$0xff] %v586_v28 }
 0x145   :  { %v821_v25 = vpop.f32.mrb[6].mxu1 }
 0x146   :  { %1588 = vst [vmem:[#allocation7 + $0x30] sm:$0xff] %v821_v25  ;;  %v823_v44 = vpop.f32.mrb[7].mxu1 }
 0x147   :  { %v738_v31 = vpop.f32.mrb[6].mxu0  ;;  %1589 = vst [vmem:[#allocation7 + $0x38] sm:$0xff] %v823_v44 }
 0x148   :  { %1586 = vst [vmem:[#allocation7 + $0x20] sm:$0xff] %v738_v31  ;;  %v740_v32 = vpop.f32.mrb[7].mxu0 }
 0x149   :  { %1587 = vst [vmem:[#allocation7 + $0x28] sm:$0xff] %v740_v32  ;;  %v827_v33 = vpop.f32.mrb[8].mxu1 }
 0x14a   :  { %1614 = vst [vmem:[#allocation7 + $0xf8] sm:$0xff] %v827_v33  ;;  %v829_v55 = vpop.f32.mrb[9].mxu1 }
 0x14b   :  { %1615 = vst [vmem:[#allocation7 + $0x100] sm:$0xff] %v829_v55  ;;  %v744_v34 = vpop.f32.mrb[8].mxu0 }
 0x14c   :  { %1612 = vst [vmem:[#allocation7 + $0xe8] sm:$0xff] %v744_v34  ;;  %v746_v37 = vpop.f32.mrb[9].mxu0 }
 0x14d   :  { %v833_v35 = vpop.f32.mrb[10].mxu1  ;;  %1613 = vst [vmem:[#allocation7 + $0xf0] sm:$0xff] %v746_v37 }
 0x14e   :  { %1639 = vst [vmem:[#allocation7 + $0x1c0] sm:$0xff] %v833_v35  ;;  %v835_v38 = vpop.f32.mrb[11].mxu1 }
 0x14f   :  { %1640 = vst [vmem:[#allocation7 + $0x1c8] sm:$0xff] %v835_v38  ;;  %v750_v40 = vpop.f32.mrb[10].mxu0 }
 0x150   :  { %1637 = vst [vmem:[#allocation7 + $0x1b0] sm:$0xff] %v750_v40  ;;  %v752_v41 = vpop.f32.mrb[11].mxu0 }
 0x151   :  { %1638 = vst [vmem:[#allocation7 + $0x1b8] sm:$0xff] %v752_v41 }
 0x169   :  { %v987_v43 = vpop.f32.mrb[12].mxu1 }
 0x16a   :  { %1592 = vst [vmem:[#allocation7 + $0x50] sm:$0xff] %v987_v43  ;;  %v989_v45 = vpop.f32.mrb[13].mxu1 }
 0x16b   :  { %v904_v22 = vpop.f32.mrb[12].mxu0  ;;  %1593 = vst [vmem:[#allocation7 + $0x58] sm:$0xff] %v989_v45 }
 0x16c   :  { %1590 = vst [vmem:[#allocation7 + $0x40] sm:$0xff] %v904_v22  ;;  %v906_v46 = vpop.f32.mrb[13].mxu0 }
 0x16d   :  { %1591 = vst [vmem:[#allocation7 + $0x48] sm:$0xff] %v906_v46  ;;  %v993_v47 = vpop.f32.mrb[14].mxu1 }
 0x16e   :  { %1618 = vst [vmem:[#allocation7 + $0x118] sm:$0xff] %v993_v47  ;;  %v995_v48 = vpop.f32.mrb[15].mxu1 }
 0x16f   :  { %1619 = vst [vmem:[#allocation7 + $0x120] sm:$0xff] %v995_v48  ;;  %v910_v49 = vpop.f32.mrb[14].mxu0 }
 0x170   :  { %1616 = vst [vmem:[#allocation7 + $0x108] sm:$0xff] %v910_v49  ;;  %v912_v51 = vpop.f32.mrb[15].mxu0 }
 0x171   :  { %v999_v50 = vpop.f32.mrb[16].mxu1  ;;  %1617 = vst [vmem:[#allocation7 + $0x110] sm:$0xff] %v912_v51 }
 0x172   :  { %1643 = vst [vmem:[#allocation7 + $0x1e0] sm:$0xff] %v999_v50  ;;  %v1001_v52 = vpop.f32.mrb[17].mxu1 }
 0x173   :  { %1644 = vst [vmem:[#allocation7 + $0x1e8] sm:$0xff] %v1001_v52  ;;  %v916_v53 = vpop.f32.mrb[16].mxu0 }
 0x174   :  { %1641 = vst [vmem:[#allocation7 + $0x1d0] sm:$0xff] %v916_v53  ;;  %v918_v54 = vpop.f32.mrb[17].mxu0 }
 0x175   :  { %1642 = vst [vmem:[#allocation7 + $0x1d8] sm:$0xff] %v918_v54 }
 0x18d   :  { %v1153_v56 = vpop.f32.mrb[18].mxu1 }
 0x18e   :  { %1596 = vst [vmem:[#allocation7 + $0x70] sm:$0xff] %v1153_v56  ;;  %v1155_v59 = vpop.f32.mrb[19].mxu1 }
 0x18f   :  { %v1070_v57 = vpop.f32.mrb[18].mxu0  ;;  %1597 = vst [vmem:[#allocation7 + $0x78] sm:$0xff] %v1155_v59 }
 0x190   :  { %1594 = vst [vmem:[#allocation7 + $0x60] sm:$0xff] %v1070_v57  ;;  %v1072_v58 = vpop.f32.mrb[19].mxu0 }
 0x191   :  { %1595 = vst [vmem:[#allocation7 + $0x68] sm:$0xff] %v1072_v58  ;;  %v1159_v60 = vpop.f32.mrb[20].mxu1 }
 0x192   :  { %1622 = vst [vmem:[#allocation7 + $0x138] sm:$0xff] %v1159_v60  ;;  %v1161_v61 = vpop.f32.mrb[21].mxu1 }
 0x193   :  { %1623 = vst [vmem:[#allocation7 + $0x140] sm:$0xff] %v1161_v61  ;;  %v1076_v62 = vpop.f32.mrb[20].mxu0 }
 0x194   :  { %1620 = vst [vmem:[#allocation7 + $0x128] sm:$0xff] %v1076_v62  ;;  %v1078_v0 = vpop.f32.mrb[21].mxu0 }
 0x195   :  { %v1165_v63 = vpop.f32.mrb[22].mxu1  ;;  %1621 = vst [vmem:[#allocation7 + $0x130] sm:$0xff] %v1078_v0 }
 0x196   :  { %1647 = vst [vmem:[#allocation7 + $0x200] sm:$0xff] %v1165_v63  ;;  %v1167_v1 = vpop.f32.mrb[23].mxu1 }
 0x197   :  { %1648 = vst [vmem:[#allocation7 + $0x208] sm:$0xff] %v1167_v1  ;;  %v1082_v2 = vpop.f32.mrb[22].mxu0 }
 0x198   :  { %1645 = vst [vmem:[#allocation7 + $0x1f0] sm:$0xff] %v1082_v2  ;;  %v1084_v18 = vpop.f32.mrb[23].mxu0 }
 0x199   :  { %1646 = vst [vmem:[#allocation7 + $0x1f8] sm:$0xff] %v1084_v18 }
 0x1b1   :  { %v1319_v3 = vpop.f32.mrb[24].mxu1 }
 0x1b2   :  { %1600 = vst [vmem:[#allocation7 + $0x90] sm:$0xff] %v1319_v3  ;;  %v1321_v4 = vpop.f32.mrb[25].mxu1 }
 0x1b3   :  { %v1236_v6 = vpop.f32.mrb[24].mxu0  ;;  %1601 = vst [vmem:[#allocation7 + $0x98] sm:$0xff] %v1321_v4 }
 0x1b4   :  { %1598 = vst [vmem:[#allocation7 + $0x80] sm:$0xff] %v1236_v6  ;;  %v1238_v7 = vpop.f32.mrb[25].mxu0 }
 0x1b5   :  { %1599 = vst [vmem:[#allocation7 + $0x88] sm:$0xff] %v1238_v7  ;;  %v1325_v8 = vpop.f32.mrb[26].mxu1 }
 0x1b6   :  { %1626 = vst [vmem:[#allocation7 + $0x158] sm:$0xff] %v1325_v8  ;;  %v1327_v21 = vpop.f32.mrb[27].mxu1 }
 0x1b7   :  { %1627 = vst [vmem:[#allocation7 + $0x160] sm:$0xff] %v1327_v21  ;;  %v1242_v39 = vpop.f32.mrb[26].mxu0 }
 0x1b8   :  { %1624 = vst [vmem:[#allocation7 + $0x148] sm:$0xff] %v1242_v39  ;;  %v1244_v10 = vpop.f32.mrb[27].mxu0 }
 0x1b9   :  { %v1331_v9 = vpop.f32.mrb[28].mxu1  ;;  %1625 = vst [vmem:[#allocation7 + $0x150] sm:$0xff] %v1244_v10 }
 0x1ba   :  { %1651 = vst [vmem:[#allocation7 + $0x220] sm:$0xff] %v1331_v9  ;;  %v1333_v5 = vpop.f32.mrb[29].mxu1 }
 0x1bb   :  { %1652 = vst [vmem:[#allocation7 + $0x228] sm:$0xff] %v1333_v5  ;;  %v1248_v11 = vpop.f32.mrb[28].mxu0 }
 0x1bc   :  { %1649 = vst [vmem:[#allocation7 + $0x210] sm:$0xff] %v1248_v11  ;;  %v1250_v12 = vpop.f32.mrb[29].mxu0 }
 0x1bd   :  { %1650 = vst [vmem:[#allocation7 + $0x218] sm:$0xff] %v1250_v12 }
 0x1d5   :  { %v1485_v13 = vpop.f32.mrb[30].mxu1 }
 0x1d6   :  { %1604 = vst [vmem:[#allocation7 + $0xb0] sm:$0xff] %v1485_v13  ;;  %v1487_v29 = vpop.f32.mrb[31].mxu1 }
 0x1d7   :  { %v1402_v14 = vpop.f32.mrb[30].mxu0  ;;  %1605 = vst [vmem:[#allocation7 + $0xb8] sm:$0xff] %v1487_v29 }
 0x1d8   :  { %1602 = vst [vmem:[#allocation7 + $0xa0] sm:$0xff] %v1402_v14  ;;  %v1404_v15 = vpop.f32.mrb[31].mxu0 }
 0x1d9   :  { %1603 = vst [vmem:[#allocation7 + $0xa8] sm:$0xff] %v1404_v15  ;;  %v1491_v16 = vpop.f32.mrb[32].mxu1 }
 0x1da   :  { %1630 = vst [vmem:[#allocation7 + $0x178] sm:$0xff] %v1491_v16  ;;  %v1493_v17 = vpop.f32.mrb[33].mxu1 }
 0x1db   :  { %1631 = vst [vmem:[#allocation7 + $0x180] sm:$0xff] %v1493_v17  ;;  %v1408_v19 = vpop.f32.mrb[32].mxu0 }
 0x1dc   :  { %1628 = vst [vmem:[#allocation7 + $0x168] sm:$0xff] %v1408_v19  ;;  %v1410_v23 = vpop.f32.mrb[33].mxu0 }
 0x1dd   :  { %v1497_v20 = vpop.f32.mrb[34].mxu1  ;;  %1629 = vst [vmem:[#allocation7 + $0x170] sm:$0xff] %v1410_v23 }
 0x1de   :  { %1655 = vst [vmem:[#allocation7 + $0x240] sm:$0xff] %v1497_v20  ;;  %v1499_v24 = vpop.f32.mrb[35].mxu1 }
 0x1df   :  { %1656 = vst [vmem:[#allocation7 + $0x248] sm:$0xff] %v1499_v24  ;;  %v1414_v26 = vpop.f32.mrb[34].mxu0 }
 0x1e0   :  { %1653 = vst [vmem:[#allocation7 + $0x230] sm:$0xff] %v1414_v26  ;;  %v1416_v27 = vpop.f32.mrb[35].mxu0 }
 0x1e1   :  { %1654 = vst [vmem:[#allocation7 + $0x238] sm:$0xff] %v1416_v27 }
 0x1f9   :  { %v1573_v36 = vpop.f32.mrb[36].mxu1 }
 0x1fa   :  { %1632 = vst.msk [vmem:[#allocation7 + $0x188] sm:$0xff] %vm1606_vm1, %v1573_v36  ;;  %v1575_v28 = vpop.f32.mrb[37].mxu1 }
 0x1fb   :  { %v1568_v30 = vpop.f32.mrb[36].mxu0 }
 0x1fc   :  { %1607 = vst.msk [vmem:[#allocation7 + $0xc0] sm:$0xff] %vm1606_vm1, %v1568_v30  ;;  %v1570_v42 = vpop.f32.mrb[37].mxu0 }
 0x1fd   :  { %v1578_v25 = vpop.f32.mrb[38].mxu1 }
 0x1fe   :  { %1657 = vst.msk [vmem:[#allocation7 + $0x250] sm:$0xff] %vm1606_vm1, %v1578_v25  ;;  %v1580_v44 = vpop.f32.mrb[39].mxu1 }
 0x1ff   :  { %2261 = shalt.err (!%p2258_p6)
}
 0x200   :  { %s2262_s12 = scalar_lea.hbm %s2504_s2, 9600 }
 0x201   :  { %p2263_p7 = scmp.ne.s32.totalorder %s2504_s2, %s2262_s12  ;;  %p2266_p8 = scmp.lt.u32.totalorder %s2262_s12, %s2504_s2 }
 0x203   :  { %p2268_p9 = pnand %p2266_p8, %p2263_p7 }
 0x205   :  { %2271 = shalt.err (!%p2268_p9)
}
 0x206   :  { %1669 = dma.vmem_to_hbm [thread:$0]  %s1664_s8, 9600, %s2504_s2, [#allocation4], %s2282_s0, %s2282_s0, %s2283_s5  }
 0x207   :  { %2276 = dma.done.wait [#allocation4], 9600  }
 0x208   :  { %2277 = vsyncadd [#allocation4], 4294957696 }
 0x209   :  { %1673 = vsyncpa [#allocation3], 1 }
 0x20a   :  { %1674 = vsyncpa [#allocation6], 1 }
 0x20b   :  { %1675 = vsyncpa [#allocation4], 1 }

</bundles_post_ra>
